<compile_context>
chip_gen: v6e
topology: v6e:2x2x1
jax: 0.10.0
libtpu: 0.0.40
codegen_flags: <defaults>
</compile_context>

<pallas_src>
import math
import numpy as np
import jax
import jax.numpy as jnp
from jax.experimental import pallas as pl
from jax.experimental.pallas import tpu as pltpu

# ----------------------- config -----------------------
BATCH = 2
SEQ = 8                          # must equal NUM_HEADS (see rotary note above)
HIDDEN = 128                     # lane-dense (multiple of 128)
NUM_HEADS = 8
HEAD_DIM = HIDDEN // NUM_HEADS   # 16
ROT_DIM = HEAD_DIM // 2          # 8
TOKENS = BATCH * SEQ             # 16
SCALE = 1.0 / math.sqrt(HEAD_DIM)
ROTARY_BASE = 10000.0
MAX_SEQ_LEN = SEQ                # module precomputes max_seq_length * 2 positions


# ----------------------- rotary tables -----------------------
def precompute_freqs_cis(dim, max_seq_len, base=10000.0):
    theta = 1.0 / base ** (jnp.arange(0, dim, 2, dtype=jnp.float32) / dim)
    seq_idx = jnp.arange(max_seq_len, dtype=jnp.float32)
    idx_theta = jnp.outer(seq_idx, theta)
    return jnp.cos(idx_theta), jnp.sin(idx_theta)


def build_rope_tables(freqs_cos, freqs_sin):
    """Expand the (seq, rot_dim) cos/sin tables into lane-dense 2D-RoPE operands.

    Because the reference broadcast aligns the cos/sin "seq" axis with the HEAD axis
    (SEQ == NUM_HEADS), the rotation applied to a (tokens, HIDDEN) row depends only on
    the column index:   rope(y) = y * cos_full + y @ rot
    where rot is a block-diagonal (per-head) half-swap scaled by +/- sin.
    """
    cos = freqs_cos[:SEQ].astype(jnp.float32)                  # (H, ROT_DIM), head-indexed
    sin = freqs_sin[:SEQ].astype(jnp.float32)
    cos_full = jnp.concatenate([cos, cos], axis=-1).reshape(1, HIDDEN)
    sin_full = jnp.concatenate([sin, sin], axis=-1).reshape(HIDDEN)

    idx = jnp.arange(HIDDEN)
    within = idx % HEAD_DIM
    first_half = within < ROT_DIM
    partner = jnp.where(first_half, idx + ROT_DIM, idx - ROT_DIM)
    signed_sin = jnp.where(first_half, sin_full, -sin_full)
    rot = jax.nn.one_hot(partner, HIDDEN, dtype=jnp.float32) * signed_sin[:, None]
    return cos_full, rot


# ----------------------- one-time parameter preparation -----------------------
def prepare_attention_params(params, freqs_cos, freqs_sin):
    """Fuse Wq/Wk/Wv and the RoPE rotation into a single (HIDDEN, 5*HIDDEN) weight.

    x @ w_fused yields [q0 | k0 | v | q0@rot | k0@rot]; RoPE then reduces to an
    element-wise cos multiply plus an add inside the kernel.  Amortized once per
    parameter set (done outside the per-call path).
    """
    cos_full, rot = build_rope_tables(freqs_cos, freqs_sin)
    wq_f32 = params['wq'].astype(jnp.float32)
    wk_f32 = params['wk'].astype(jnp.float32)
    w_fused = jnp.concatenate(
        [params['wq'], params['wk'], params['wv'],
         (wq_f32 @ rot).astype(jnp.bfloat16),
         (wk_f32 @ rot).astype(jnp.bfloat16)],
        axis=1)                                                 # (HIDDEN, 5*HIDDEN) bf16
    return {'w_fused': w_fused, 'wo': params['wo'], 'cos': cos_full}


# ----------------------- the fused Pallas kernel -----------------------
def mha_kernel(x_ref,        # (TOKENS, HIDDEN) f32
               wf_ref,       # (HIDDEN, 5*HIDDEN) bf16: [Wq | Wk | Wv | Wq@rot | Wk@rot]
               wo_ref,       # (HIDDEN, HIDDEN) bf16, pre-transposed (in, out)
               cos_ref,      # (1, HIDDEN) f32
               out_ref):     # (TOKENS, HIDDEN) f32
    xb = x_ref[...].astype(jnp.bfloat16)     # bf16 only as MXU operand; VPU math in f32

    # Single MXU call for q/k/v projections + RoPE sin component.
    qkv = jnp.dot(xb, wf_ref[...], preferred_element_type=jnp.float32)   # (T, 5*HIDDEN)

    cos = cos_ref[...]
    q = qkv[:, 0 * HIDDEN:1 * HIDDEN] * cos + qkv[:, 3 * HIDDEN:4 * HIDDEN]
    k = qkv[:, 1 * HIDDEN:2 * HIDDEN] * cos + qkv[:, 4 * HIDDEN:5 * HIDDEN]
    v = qkv[:, 2 * HIDDEN:3 * HIDDEN]

    # ---- per-batch attention (B is tiny and static -> unrolled Python loop) ----
    ctx_rows = []
    for b in range(BATCH):
        r0 = b * SEQ
        qb = q[r0:r0 + SEQ, :].reshape(SEQ, NUM_HEADS, HEAD_DIM)
        kb = k[r0:r0 + SEQ, :].reshape(SEQ, NUM_HEADS, HEAD_DIM)
        vb = v[r0:r0 + SEQ, :].reshape(SEQ, NUM_HEADS, HEAD_DIM)

        # dot_general batched over heads; softmax reduction over the key axis
        scores = jnp.einsum('qhd,khd->hqk', qb, kb,
                            preferred_element_type=jnp.float32) * SCALE
        scores = scores - jnp.max(scores, axis=-1, keepdims=True)
        p = jnp.exp(scores)
        p = p * pl.reciprocal(jnp.sum(p, axis=-1, keepdims=True), approx=True)

        ctx = jnp.einsum('hqk,khd->qhd', p, vb, preferred_element_type=jnp.float32)
        ctx_rows.append(ctx.reshape(SEQ, HIDDEN))

    ctx2d = jnp.concatenate(ctx_rows, axis=0)          # (TOKENS, HIDDEN), lane-dense

    # ---- output projection (one MXU call for all tokens) ----
    out = jnp.dot(ctx2d.astype(jnp.bfloat16), wo_ref[...],
                  preferred_element_type=jnp.float32)
    out_ref[...] = out.astype(out_ref.dtype)


# ----------------------- wrapper -----------------------
def multi_head_attention(x, prepared):
    B, S, C = x.shape
    T = B * S
    x2d = x.reshape(T, C)                              # fold batch -> one grid step

    def full(shape):
        return pl.BlockSpec(shape, lambda i, _n=len(shape): (0,) * _n)

    out2d = pl.pallas_call(
        mha_kernel,
        out_shape=jax.ShapeDtypeStruct((T, C), x.dtype),
        grid=(1,),
        in_specs=[
            full((T, C)),                              # x  (tokens, hidden)
            full((C, 5 * C)),                          # fused qkv + rope weights
            full((C, C)),                              # wo
            full((1, C)),                              # rope cos
        ],
        out_specs=full((T, C)),                        # lane-dense output (last dim 128)
        compiler_params=pltpu.CompilerParams(dimension_semantics=("arbitrary",)),
    )(x2d, prepared['w_fused'], prepared['wo'], prepared['cos'])

    # TODO(synk): attention_mask, past_kv / use_cache, GQA kv-repeat and sliding-window
    # masking are not exercised by this eval config and are not implemented in-kernel.
    return out2d.reshape(B, S, C), None                # (attn_output, current_kv)


# ----------------------- pure-JAX reference (mirrors the PyTorch forward) -----------------------
def ref_apply_rotary_emb(x, freqs_cos, freqs_sin):
    b, s, h, d = x.shape
    xv = x.reshape(b, s, h, 2, d // 2)
    x1, x2 = xv[..., 0, :], xv[..., 1, :]
    cos = freqs_cos[:s]          # (s, d//2): broadcasts against the HEAD axis (s == h)
    sin = freqs_sin[:s]
    r1 = x1 * cos - x2 * sin
    r2 = x1 * sin + x2 * cos
    return jnp.stack([r1, r2], axis=-2).reshape(b, s, h, d)


def ref_multi_head_attention(x, p, freqs_cos, freqs_sin):
    B, S, C = x.shape
    wq, wk, wv, wo = (p[n].astype(jnp.float32) for n in ('wq', 'wk', 'wv', 'wo'))
    q = (x @ wq).reshape(B, S, NUM_HEADS, HEAD_DIM)
    k = (x @ wk).reshape(B, S, NUM_HEADS, HEAD_DIM)
    v = (x @ wv).reshape(B, S, NUM_HEADS, HEAD_DIM)
    q = ref_apply_rotary_emb(q, freqs_cos, freqs_sin)
    k = ref_apply_rotary_emb(k, freqs_cos, freqs_sin)
    q, k, v = (jnp.swapaxes(t, 1, 2) for t in (q, k, v))       # (B, H, S, D)
    scores = jnp.einsum('bhqd,bhkd->bhqk', q, k) / math.sqrt(HEAD_DIM)
    wts = jax.nn.softmax(scores, axis=-1)
    attn = jnp.einsum('bhqk,bhkd->bhqd', wts, v)
    attn = jnp.swapaxes(attn, 1, 2).reshape(B, S, C)
    return attn @ wo


# ----------------------- main -----------------------
if __name__ == "__main__":
    key = jax.random.PRNGKey(0)
    keys = jax.random.split(key, 6)

    x = jax.random.normal(keys[0], (BATCH, SEQ, HIDDEN), jnp.float32)

    # Linear weights stored pre-transposed as (in, out): y = x @ W.
    # Stored in bf16 (native MXU dtype, half the weight DMA bytes); the kernel
    # accumulates in f32 and the reference uses the same (upcast) weights.
    def w(k, shape, scale=0.1):
        return (scale * jax.random.normal(k, shape, jnp.float32)).astype(jnp.bfloat16)

    params = {
        'wq': w(keys[1], (HIDDEN, HIDDEN)),
        'wk': w(keys[2], (HIDDEN, HIDDEN)),
        'wv': w(keys[3], (HIDDEN, HIDDEN)),
        'wo': w(keys[4], (HIDDEN, HIDDEN)),
    }

    freqs_cos, freqs_sin = precompute_freqs_cis(HEAD_DIM, MAX_SEQ_LEN * 2, ROTARY_BASE)

    prepared = prepare_attention_params(params, freqs_cos, freqs_sin)

    out, current_kv = multi_head_attention(x, prepared)
    out = jax.block_until_ready(out)

    ref = ref_multi_head_attention(x, params, freqs_cos, freqs_sin)
    np.testing.assert_allclose(np.asarray(out), np.asarray(ref), rtol=2e-2, atol=2e-2)

    print("KERNEL_OK")
</pallas_src>

<mosaic_0001>
module attributes {stable_mosaic.version = 11 : i64} {
  func.func @mha_kernel(%arg0: i32, %arg1: memref<16x128xf32, #tpu.memory_space<vmem>>, %arg2: memref<128x640xbf16, #tpu.memory_space<vmem>>, %arg3: memref<128x128xbf16, #tpu.memory_space<vmem>>, %arg4: memref<1x128xf32, #tpu.memory_space<vmem>>, %arg5: memref<16x128xf32, #tpu.memory_space<vmem>>) attributes {dimension_semantics = [#tpu.dimension_semantics<arbitrary>], iteration_bounds = array<i64: 1>, scalar_prefetch = 0 : i64, scratch_operands = 0 : i64, tpu.core_type = #tpu.core_type<tc>, window_params = [{pipeline_mode = #tpu.pipeline_mode<synchronous>, transform_indices = @transform_0, window_bounds = array<i64: 16, 128>}, {pipeline_mode = #tpu.pipeline_mode<synchronous>, transform_indices = @transform_1, window_bounds = array<i64: 128, 640>}, {pipeline_mode = #tpu.pipeline_mode<synchronous>, transform_indices = @transform_2, window_bounds = array<i64: 128, 128>}, {pipeline_mode = #tpu.pipeline_mode<synchronous>, transform_indices = @transform_3, window_bounds = array<i64: 1, 128>}, {pipeline_mode = #tpu.pipeline_mode<synchronous>, transform_indices = @transform_4, window_bounds = array<i64: 16, 128>}]} {
    %c0 = arith.constant 0 : index
    %c0_0 = arith.constant 0 : index
    %0 = vector.load %arg1[%c0, %c0_0] : memref<16x128xf32, #tpu.memory_space<vmem>>, vector<16x128xf32>
    %1 = arith.truncf %0 : vector<16x128xf32> to vector<16x128xbf16>
    %c0_1 = arith.constant 0 : index
    %c0_2 = arith.constant 0 : index
    %2 = vector.load %arg2[%c0_1, %c0_2] : memref<128x640xbf16, #tpu.memory_space<vmem>>, vector<128x640xbf16>
    %cst = arith.constant dense<0.000000e+00> : vector<16x640xf32>
    %3 = tpu.matmul %1, %2, %cst {dimension_numbers = #tpu.dot_dimension_numbers<[1], [0], [0], [1], [0, 0, 1, 1], [], []>} : vector<16x128xbf16>, vector<128x640xbf16>, vector<16x640xf32> -> vector<16x640xf32>
    %c0_3 = arith.constant 0 : index
    %c0_4 = arith.constant 0 : index
    %4 = vector.load %arg4[%c0_3, %c0_4] : memref<1x128xf32, #tpu.memory_space<vmem>>, vector<1x128xf32>
    %5 = vector.extract_strided_slice %3 {offsets = [0, 0], sizes = [16, 128], strides = [1, 1]} : vector<16x640xf32> to vector<16x128xf32>
    %6 = vector.broadcast %4 : vector<1x128xf32> to vector<16x128xf32>
    %7 = arith.mulf %5, %6 : vector<16x128xf32>
    %8 = vector.extract_strided_slice %3 {offsets = [0, 384], sizes = [16, 128], strides = [1, 1]} : vector<16x640xf32> to vector<16x128xf32>
    %9 = arith.addf %7, %8 : vector<16x128xf32>
    %10 = vector.extract_strided_slice %3 {offsets = [0, 128], sizes = [16, 128], strides = [1, 1]} : vector<16x640xf32> to vector<16x128xf32>
    %11 = vector.broadcast %4 : vector<1x128xf32> to vector<16x128xf32>
    %12 = arith.mulf %10, %11 : vector<16x128xf32>
    %13 = vector.extract_strided_slice %3 {offsets = [0, 512], sizes = [16, 128], strides = [1, 1]} : vector<16x640xf32> to vector<16x128xf32>
    %14 = arith.addf %12, %13 : vector<16x128xf32>
    %15 = vector.extract_strided_slice %3 {offsets = [0, 256], sizes = [16, 128], strides = [1, 1]} : vector<16x640xf32> to vector<16x128xf32>
    %16 = vector.extract_strided_slice %9 {offsets = [0, 0], sizes = [8, 128], strides = [1, 1]} : vector<16x128xf32> to vector<8x128xf32>
    %17 = vector.shape_cast %16 : vector<8x128xf32> to vector<8x8x16xf32>
    %18 = vector.extract_strided_slice %14 {offsets = [0, 0], sizes = [8, 128], strides = [1, 1]} : vector<16x128xf32> to vector<8x128xf32>
    %19 = vector.shape_cast %18 : vector<8x128xf32> to vector<8x8x16xf32>
    %20 = vector.extract_strided_slice %15 {offsets = [0, 0], sizes = [8, 128], strides = [1, 1]} : vector<16x128xf32> to vector<8x128xf32>
    %21 = vector.shape_cast %20 : vector<8x128xf32> to vector<8x8x16xf32>
    "tpu.trace_start"() <{level = 10 : i32, message = "qhd,khd->hqk"}> : () -> ()
    %cst_5 = arith.constant dense<0.000000e+00> : vector<8x8x8xf32>
    %22 = tpu.matmul %17, %19, %cst_5 {dimension_numbers = #tpu.dot_dimension_numbers<[2], [2], [0], [0], [0, 1, 0, 0, 1, 0], [1], [1]>} : vector<8x8x16xf32>, vector<8x8x16xf32>, vector<8x8x8xf32> -> vector<8x8x8xf32>
    "tpu.trace_stop"() : () -> ()
    %cst_6 = arith.constant 2.500000e-01 : f32
    %23 = vector.broadcast %cst_6 : f32 to vector<8x8x8xf32>
    %24 = arith.mulf %22, %23 : vector<8x8x8xf32>
    %cst_7 = arith.constant dense<0xFF800000> : vector<8x8xf32>
    %25 = vector.multi_reduction <maximumf>, %24, %cst_7 [2] : vector<8x8x8xf32> to vector<8x8xf32>
    %26 = vector.shape_cast %25 : vector<8x8xf32> to vector<8x8x1xf32>
    %27 = vector.broadcast %26 : vector<8x8x1xf32> to vector<8x8x8xf32>
    %28 = arith.subf %24, %27 : vector<8x8x8xf32>
    %29 = math.exp %28 : vector<8x8x8xf32>
    %cst_8 = arith.constant dense<0.000000e+00> : vector<8x8xf32>
    %30 = vector.multi_reduction <add>, %29, %cst_8 [2] : vector<8x8x8xf32> to vector<8x8xf32>
    %31 = vector.shape_cast %30 : vector<8x8xf32> to vector<8x8x1xf32>
    %32 = tpu.reciprocal %31 {approx = true} : vector<8x8x1xf32> -> vector<8x8x1xf32>
    %33 = vector.broadcast %32 : vector<8x8x1xf32> to vector<8x8x8xf32>
    %34 = arith.mulf %29, %33 : vector<8x8x8xf32>
    "tpu.trace_start"() <{level = 10 : i32, message = "hqk,khd->qhd"}> : () -> ()
    %cst_9 = arith.constant dense<0.000000e+00> : vector<8x16x8xf32>
    %35 = tpu.matmul %21, %34, %cst_9 {dimension_numbers = #tpu.dot_dimension_numbers<[0], [2], [2], [1], [0, 1, 0, 2, 1, 1], [1], [0]>} : vector<8x8x16xf32>, vector<8x8x8xf32>, vector<8x16x8xf32> -> vector<8x16x8xf32>
    %36 = tpu.transpose %35, [2, 0, 1] : vector<8x16x8xf32> -> vector<8x8x16xf32>
    "tpu.trace_stop"() : () -> ()
    %37 = vector.shape_cast %36 : vector<8x8x16xf32> to vector<8x128xf32>
    %38 = vector.extract_strided_slice %9 {offsets = [8, 0], sizes = [8, 128], strides = [1, 1]} : vector<16x128xf32> to vector<8x128xf32>
    %39 = vector.shape_cast %38 : vector<8x128xf32> to vector<8x8x16xf32>
    %40 = vector.extract_strided_slice %14 {offsets = [8, 0], sizes = [8, 128], strides = [1, 1]} : vector<16x128xf32> to vector<8x128xf32>
    %41 = vector.shape_cast %40 : vector<8x128xf32> to vector<8x8x16xf32>
    %42 = vector.extract_strided_slice %15 {offsets = [8, 0], sizes = [8, 128], strides = [1, 1]} : vector<16x128xf32> to vector<8x128xf32>
    %43 = vector.shape_cast %42 : vector<8x128xf32> to vector<8x8x16xf32>
    "tpu.trace_start"() <{level = 10 : i32, message = "qhd,khd->hqk"}> : () -> ()
    %cst_10 = arith.constant dense<0.000000e+00> : vector<8x8x8xf32>
    %44 = tpu.matmul %39, %41, %cst_10 {dimension_numbers = #tpu.dot_dimension_numbers<[2], [2], [0], [0], [0, 1, 0, 0, 1, 0], [1], [1]>} : vector<8x8x16xf32>, vector<8x8x16xf32>, vector<8x8x8xf32> -> vector<8x8x8xf32>
    "tpu.trace_stop"() : () -> ()
    %cst_11 = arith.constant 2.500000e-01 : f32
    %45 = vector.broadcast %cst_11 : f32 to vector<8x8x8xf32>
    %46 = arith.mulf %44, %45 : vector<8x8x8xf32>
    %cst_12 = arith.constant dense<0xFF800000> : vector<8x8xf32>
    %47 = vector.multi_reduction <maximumf>, %46, %cst_12 [2] : vector<8x8x8xf32> to vector<8x8xf32>
    %48 = vector.shape_cast %47 : vector<8x8xf32> to vector<8x8x1xf32>
    %49 = vector.broadcast %48 : vector<8x8x1xf32> to vector<8x8x8xf32>
    %50 = arith.subf %46, %49 : vector<8x8x8xf32>
    %51 = math.exp %50 : vector<8x8x8xf32>
    %cst_13 = arith.constant dense<0.000000e+00> : vector<8x8xf32>
    %52 = vector.multi_reduction <add>, %51, %cst_13 [2] : vector<8x8x8xf32> to vector<8x8xf32>
    %53 = vector.shape_cast %52 : vector<8x8xf32> to vector<8x8x1xf32>
    %54 = tpu.reciprocal %53 {approx = true} : vector<8x8x1xf32> -> vector<8x8x1xf32>
    %55 = vector.broadcast %54 : vector<8x8x1xf32> to vector<8x8x8xf32>
    %56 = arith.mulf %51, %55 : vector<8x8x8xf32>
    "tpu.trace_start"() <{level = 10 : i32, message = "hqk,khd->qhd"}> : () -> ()
    %cst_14 = arith.constant dense<0.000000e+00> : vector<8x16x8xf32>
    %57 = tpu.matmul %43, %56, %cst_14 {dimension_numbers = #tpu.dot_dimension_numbers<[0], [2], [2], [1], [0, 1, 0, 2, 1, 1], [1], [0]>} : vector<8x8x16xf32>, vector<8x8x8xf32>, vector<8x16x8xf32> -> vector<8x16x8xf32>
    %58 = tpu.transpose %57, [2, 0, 1] : vector<8x16x8xf32> -> vector<8x8x16xf32>
    "tpu.trace_stop"() : () -> ()
    %59 = vector.shape_cast %58 : vector<8x8x16xf32> to vector<8x128xf32>
    %60 = tpu.concatenate %37, %59 in 0 : vector<8x128xf32>, vector<8x128xf32> -> vector<16x128xf32>
    %61 = arith.truncf %60 : vector<16x128xf32> to vector<16x128xbf16>
    %c0_15 = arith.constant 0 : index
    %c0_16 = arith.constant 0 : index
    %62 = vector.load %arg3[%c0_15, %c0_16] : memref<128x128xbf16, #tpu.memory_space<vmem>>, vector<128x128xbf16>
    %cst_17 = arith.constant dense<0.000000e+00> : vector<16x128xf32>
    %63 = tpu.matmul %61, %62, %cst_17 {dimension_numbers = #tpu.dot_dimension_numbers<[1], [0], [0], [1], [0, 0, 1, 1], [], []>} : vector<16x128xbf16>, vector<128x128xbf16>, vector<16x128xf32> -> vector<16x128xf32>
    %c0_18 = arith.constant 0 : index
    %c0_19 = arith.constant 0 : index
    %64 = vector.load %arg5[%c0_18, %c0_19] : memref<16x128xf32, #tpu.memory_space<vmem>>, vector<16x128xf32>
    tpu.vector_store %arg5[%c0_18, %c0_19], %63 {strides = array<i32>} : memref<16x128xf32, #tpu.memory_space<vmem>>, vector<16x128xf32>,
    return
  }
  func.func @transform_0(%arg0: i32) -> (i32, i32) {
    %c0_i32 = arith.constant 0 : i32
    %c0_i32_0 = arith.constant 0 : i32
    %c0_i32_1 = arith.constant 0 : i32
    return %c0_i32, %c0_i32_0 : i32, i32
  }
  func.func @transform_1(%arg0: i32) -> (i32, i32) {
    %c0_i32 = arith.constant 0 : i32
    %c0_i32_0 = arith.constant 0 : i32
    %c0_i32_1 = arith.constant 0 : i32
    return %c0_i32, %c0_i32_0 : i32, i32
  }
  func.func @transform_2(%arg0: i32) -> (i32, i32) {
    %c0_i32 = arith.constant 0 : i32
    %c0_i32_0 = arith.constant 0 : i32
    %c0_i32_1 = arith.constant 0 : i32
    return %c0_i32, %c0_i32_0 : i32, i32
  }
  func.func @transform_3(%arg0: i32) -> (i32, i32) {
    %c0_i32 = arith.constant 0 : i32
    %c0_i32_0 = arith.constant 0 : i32
    %c0_i32_1 = arith.constant 0 : i32
    return %c0_i32, %c0_i32_0 : i32, i32
  }
  func.func @transform_4(%arg0: i32) -> (i32, i32) {
    %c0_i32 = arith.constant 0 : i32
    %c0_i32_0 = arith.constant 0 : i32
    %c0_i32_1 = arith.constant 0 : i32
    return %c0_i32, %c0_i32_0 : i32, i32
  }
}

</mosaic_0001>

<bundles_post_ra>
// kernel: tpu_custom_call.1
= control target key start
LH: loop header
LB: loop body
LE: loop exit
PB: predicated region body
PF: predicated region fallthrough
CT: control target
= control target key end

     0   :  { %9 = vsyncpa [#allocation3], 0  ;;  %s6948_s0 = inlined_call_operand.hbm [shape: f32[16,128], index: 0, kind: input, shape index: {}]   ;;  %s6949_s1 = inlined_call_operand.hbm [shape: bf16[128,640], index: 1, kind: input, shape index: {}]   ;;  %s6950_s2 = inlined_call_operand.hbm [shape: bf16[128,128], index: 2, kind: input, shape index: {}]   ;;  %s6951_s3 = inlined_call_operand.vmem [shape: f32[1,128], index: 3, kind: input, shape index: {}]   ;;  %s6952_s4 = inlined_call_operand.hbm [shape: f32[16,128], index: 4, kind: output, shape index: {}]  }
   0x1   :  { %10 = vsyncpa [#allocation6], 0 }
   0x2   :  { %11 = vsyncpa [#allocation4], 0  ;;  %s6296_s15 = smov [#allocation5]  }
   0x3   :  { %s29_s16 = sshll.u32 %s6296_s15, 4  ;;  %s30_s16 = int_to_ptr.vmem [resolvable:$true] %s29_s16 }
   0x4   :  { %s6218_s17 = scalar_lea.vmem %s30_s16, 5120  ;;  %p6223_p1 = scmp.lt.s32.totalorder %s30_s16, %s30_s16 }
   0x5   :  { %p6219_p0 = scmp.ne.s32.totalorder %s30_s16, %s6218_s17  ;;  %p6224_p2 = scmp.lt.s32.totalorder %s6218_s17, %s6218_s17 }
   0x7   :  { %p6225_p3 = por %p6224_p2, %p6223_p1 }
   0x9   :  { %p6226_p4 = pnand %p6225_p3, %p6219_p0 }
   0xb   :  { %6229 = shalt.err (!%p6226_p4)
}
   0xc   :  { %s6297_s18 = smov 320   ;;  %s6298_s19 = smov 20  }
   0xd   :  { %35 = dma.hbm_to_vmem [thread:$0]  %s6949_s1, 5120, %s30_s16, [#allocation6], %s6297_s18, %s6297_s18, %s6298_s19  }
   0xe   :  { %s6299_s22 = smov [#allocation2]  }
   0xf   :  { %s17_s23 = sshll.u32 %s6299_s22, 4  ;;  %s18_s23 = int_to_ptr.vmem [resolvable:$true] %s17_s23 }
  0x10   :  { %s6238_s24 = scalar_lea.vmem %s18_s23, 256  ;;  %p6243_p6 = scmp.lt.s32.totalorder %s18_s23, %s18_s23 }
  0x11   :  { %p6239_p5 = scmp.ne.s32.totalorder %s18_s23, %s6238_s24  ;;  %p6244_p7 = scmp.lt.s32.totalorder %s6238_s24, %s6238_s24 }
  0x13   :  { %p6245_p8 = por %p6244_p7, %p6243_p6 }
  0x15   :  { %p6246_p9 = pnand %p6245_p8, %p6239_p5 }
  0x17   :  { %6249 = shalt.err (!%p6246_p9)
}
  0x18   :  { %s6300_s25 = smov 128   ;;  %s6301_s26 = smov 8  }
  0x19   :  { %23 = dma.hbm_to_vmem [thread:$0]  %s6948_s0, 256, %s18_s23, [#allocation3], %s6300_s25, %s6300_s25, %s6301_s26  }
  0x1a   :  { %s6302_s1 = smov [#allocation7]  }
  0x1b   :  { %s41_s29 = sshll.u32 %s6302_s1, 4  ;;  %s42_s29 = int_to_ptr.vmem [resolvable:$true] %s41_s29 }
  0x1c   :  { %s6258_s30 = scalar_lea.vmem %s42_s29, 1024  ;;  %p6263_p11 = scmp.lt.s32.totalorder %s42_s29, %s42_s29 }
  0x1d   :  { %p6259_p10 = scmp.ne.s32.totalorder %s42_s29, %s6258_s30  ;;  %p6264_p12 = scmp.lt.s32.totalorder %s6258_s30, %s6258_s30 }
  0x1f   :  { %p6265_p13 = por %p6264_p12, %p6263_p11 }
  0x21   :  { %p6266_p0 = pnand %p6265_p13, %p6259_p10 }
  0x23   :  { %6269 = shalt.err (!%p6266_p0)
}
  0x24   :  { %s6303_s5 = smov 64   ;;  %s6304_s6 = smov 4  }
  0x25   :  { %47 = dma.hbm_to_vmem [thread:$0]  %s6950_s2, 1024, %s42_s29, [#allocation6], %s6303_s5, %s6303_s5, %s6304_s6  }
  0x26   :  { %6290 = dma.done.wait [#allocation3], 256  }
  0x27   :  { %6291 = vsyncadd [#allocation3], 4294967040 }
  0x28   :  { %6292 = dma.done.wait [#allocation6], 6144  }
  0x29   :  { %6293 = vsyncadd [#allocation6], 4294961152  ;;  %v6305_v0 = vmov 0.0   ;;  %vm6306_vm0 = vmmov 0   ;;  %v6307_v1 = vmov 0   ;;  %v60_v25 = vld [vmem:[#allocation2] sm:$0xff] }
  0x2a   :  { %5794 = vmatprep.subr.bf16.mxu0 %v6305_v0  ;;  %5810 = vmatprep.mubr.msk.bf16.mxu0 %vm6306_vm0, %v6305_v0  ;;  %v6082_v2 = vld [vmem:[#allocation5 + $0x11c] ss:$20 sps:$4 sm:$0xff]   ;;  %v6085_v4 = vld [vmem:[#allocation5 + $0x118] ss:$20 sps:$4 sm:$0xff]   ;;  %v6086_v5 = vld [vmem:[#allocation5 + $0xf4] ss:$20 sps:$4 sm:$0xff]  }
  0x2b   :  { %351 = vmatprep.mubr.bf16.mxu1 %v6307_v1  ;;  %v6084_v3 = vld [vmem:[#allocation5 + $0x128] ss:$20 sps:$4 sm:$0xff]   ;;  %319 = vmatprep.subr.bf16.mxu1 %v6082_v2  ;;  %v6088_v6 = vld [vmem:[#allocation5 + $0x100] ss:$20 sps:$4 sm:$0xff]   ;;  %v6089_v7 = vld [vmem:[#allocation5 + $0xf0] ss:$20 sps:$4 sm:$0xff]  }
  0x2c   :  { %5795 = vmatpush3.bf16.msra.mxu0 %v6084_v3  ;;  %320 = vmatpush1.bf16.msra.mxu1 %v6085_v4  ;;  %v6090_v8 = vld [vmem:[#allocation5 + $0xcc] ss:$20 sps:$4 sm:$0xff]   ;;  %v6093_v10 = vld [vmem:[#allocation5 + $0xc8] ss:$20 sps:$4 sm:$0xff]   ;;  %v6094_v11 = vld [vmem:[#allocation5 + $0xa4] ss:$20 sps:$4 sm:$0xff]  }
  0x2d   :  { %5796 = vmatprep.subr.bf16.mxu0 %v6305_v0  ;;  %321 = vmatprep.subr.bf16.mxu1 %v6086_v5  ;;  %v6092_v9 = vld [vmem:[#allocation5 + $0xd8] ss:$20 sps:$4 sm:$0xff]   ;;  %v6096_v12 = vld [vmem:[#allocation5 + $0xb0] ss:$20 sps:$4 sm:$0xff]   ;;  %v6097_v13 = vld [vmem:[#allocation5 + $0xa0] ss:$20 sps:$4 sm:$0xff]  }
  0x2e   :  { %v6098_v14 = vld [vmem:[#allocation5 + $0x7c] ss:$20 sps:$4 sm:$0xff]   ;;  %v6101_v16 = vld [vmem:[#allocation5 + $0x78] ss:$20 sps:$4 sm:$0xff]   ;;  %v6102_v17 = vld [vmem:[#allocation5 + $0x54] ss:$20 sps:$4 sm:$0xff]  }
  0x2f   :  { %v6100_v15 = vld [vmem:[#allocation5 + $0x88] ss:$20 sps:$4 sm:$0xff]   ;;  %v6104_v18 = vld [vmem:[#allocation5 + $0x60] ss:$20 sps:$4 sm:$0xff]   ;;  %v6105_v19 = vld [vmem:[#allocation5 + $0x50] ss:$20 sps:$4 sm:$0xff]  }
  0x30   :  { %5797 = vmatpush3.bf16.msra.mxu0 %v6088_v6  ;;  %322 = vmatpush1.bf16.msra.mxu1 %v6089_v7  ;;  %v6106_v20 = vld [vmem:[#allocation5 + $0x2c] ss:$20 sps:$4 sm:$0xff]   ;;  %v6109_v22 = vld [vmem:[#allocation5 + $0x28] ss:$20 sps:$4 sm:$0xff]   ;;  %v6110_v23 = vld [vmem:[#allocation5 + $0x4] ss:$20 sps:$4 sm:$0xff]  }
  0x31   :  { %5798 = vmatprep.subr.bf16.mxu0 %v6305_v0  ;;  %323 = vmatprep.subr.bf16.mxu1 %v6090_v8  ;;  %v6108_v21 = vld [vmem:[#allocation5 + $0x38] ss:$20 sps:$4 sm:$0xff]   ;;  %v6112_v24 = vld [vmem:[#allocation5 + $0x10] ss:$20 sps:$4 sm:$0xff]   ;;  %v6113_v27 = vld [vmem:[#allocation5] ss:$20 sps:$4 sm:$0xff]  }
  0x32   :  { %v61_v26 = vld [vmem:[#allocation2 + $0x8] sm:$0xff]  ;;  %v6114_v30 = vld [vmem:[#allocation5 + $0x120] ss:$20 sps:$4 sm:$0xff]   ;;  %v6120_v34 = vld [vmem:[#allocation5 + $0xd0] ss:$20 sps:$4 sm:$0xff]   ;;  %s6308_s9 = smov 80  }
  0x33   :  { %v6116_v28 = vld [vmem:[#allocation5 + $0x124] ss:$20 sps:$4 sm:$0xff]   ;;  %v62_v29 = vpack.c.bf16 %v61_v26, %v60_v25  ;;  %v6119_v31 = vld [vmem:[#allocation5 + $0xfc] ss:$20 sps:$4 sm:$0xff]   ;;  %v6122_v33 = vld [vmem:[#allocation5 + $0xd4] ss:$20 sps:$4 sm:$0xff]  }
  0x34   :  { %5799 = vmatpush3.bf16.msra.mxu0 %v6092_v9  ;;  %324 = vmatpush1.bf16.msra.mxu1 %v6093_v10  ;;  %v6117_v32 = vld [vmem:[#allocation5 + $0xf8] ss:$20 sps:$4 sm:$0xff]   ;;  %v6123_v36 = vld [vmem:[#allocation5 + $0xa8] ss:$20 sps:$4 sm:$0xff]   ;;  %v6126_v38 = vld [vmem:[#allocation5 + $0x80] ss:$20 sps:$4 sm:$0xff]  }
  0x35   :  { %5800 = vmatprep.subr.bf16.mxu0 %v6305_v0  ;;  %325 = vmatprep.subr.bf16.mxu1 %v6094_v11  ;;  %v6125_v35 = vld [vmem:[#allocation5 + $0xac] ss:$20 sps:$4 sm:$0xff]   ;;  %v6128_v37 = vld [vmem:[#allocation5 + $0x84] ss:$20 sps:$4 sm:$0xff]   ;;  %v6131_v39 = vld [vmem:[#allocation5 + $0x5c] ss:$20 sps:$4 sm:$0xff]  }
  0x36   :  { %v6129_v40 = vld [vmem:[#allocation5 + $0x58] ss:$20 sps:$4 sm:$0xff]   ;;  %v6134_v41 = vld [vmem:[#allocation5 + $0x34] ss:$20 sps:$4 sm:$0xff]   ;;  %v6132_v42 = vld [vmem:[#allocation5 + $0x30] ss:$20 sps:$4 sm:$0xff]  }
  0x37   :  { %v6137_v43 = vld [vmem:[#allocation5 + $0xc] ss:$20 sps:$4 sm:$0xff]   ;;  %v6135_v44 = vld [vmem:[#allocation5 + $0x8] ss:$20 sps:$4 sm:$0xff]   ;;  %v5591_v48 = vld [vmem:[%s6951_s3] ss:$0 sm:$0xff] }
  0x38   :  { %5801 = vmatpush3.bf16.msra.mxu0 %v6096_v12  ;;  %326 = vmatpush1.bf16.msra.mxu1 %v6097_v13  ;;  %s6309_s10 = smov 96   ;;  %s6310_s3 = smov 112   ;;  %vm776_vm1 = vcmask 130048   ;;  %vm1361_vm2 = vcmask 64512   ;;  %vm2935_vm3 = vcmask 261120   ;;  %vm2937_vm4 = vcmask 392192  }
  0x39   :  { %5802 = vmatprep.subr.bf16.mxu0 %v6305_v0  ;;  %327 = vmatprep.subr.bf16.mxu1 %v6098_v14  ;;  %s6311_s11 = smov 32   ;;  %s6312_s12 = smov 48   ;;  %vm2939_vm5 = vcmask 523264   ;;  %vm2941_vm6 = vcmask 654336   ;;  %vm2943_vm7 = vcmask 785408   ;;  %vm2945_vm8 = vcmask 916480  }
  0x3a   :  { %s6313_s13 = smov 16   ;;  %s6316_s14 = smov [#allocation8]  }
  0x3b   :  { %s5538_s15 = sshll.u32 %s6316_s14, 4  ;;  %s5539_s15 = int_to_ptr.vmem [resolvable:$true] %s5538_s15 }
  0x3c   :  { %5803 = vmatpush3.bf16.msra.mxu0 %v6100_v15  ;;  %328 = vmatpush1.bf16.msra.mxu1 %v6101_v16  ;;  %s6270_s16 = scalar_lea.vmem %s5539_s15, 256  ;;  %p6275_p2 = scmp.lt.s32.totalorder %s5539_s15, %s5539_s15 }
  0x3d   :  { %5804 = vmatprep.subr.bf16.mxu0 %v6305_v0  ;;  %329 = vmatprep.subr.bf16.mxu1 %v6102_v17  ;;  %p6271_p1 = scmp.ne.s32.totalorder %s5539_s15, %s6270_s16  ;;  %p6276_p3 = scmp.lt.s32.totalorder %s6270_s16, %s6270_s16 }
  0x3f   :  { %p6277_p4 = por %p6276_p3, %p6275_p2 }
  0x40   :  { %5805 = vmatpush3.bf16.msra.mxu0 %v6104_v18  ;;  %330 = vmatpush1.bf16.msra.mxu1 %v6105_v19 }
  0x41   :  { %5806 = vmatprep.subr.bf16.mxu0 %v6305_v0  ;;  %331 = vmatprep.subr.bf16.mxu1 %v6106_v20  ;;  %p6278_p5 = pnand %p6277_p4, %p6271_p1 }
  0x44   :  { %5807 = vmatpush3.bf16.msra.mxu0 %v6108_v21  ;;  %332 = vmatpush1.bf16.msra.mxu1 %v6109_v22 }
  0x45   :  { %5808 = vmatprep.subr.bf16.mxu0 %v6305_v0  ;;  %333 = vmatprep.subr.bf16.mxu1 %v6110_v23 }
  0x48   :  { %5809 = vmatpush3.bf16.msra.mxu0 %v6112_v24  ;;  %334 = vmatpush1.bf16.msra.mxu1 %v6113_v27 }
  0x49   :  { %5814 = vmatprep.subr.mxu0 %v6305_v0  ;;  %362 = vmatprep.subr.bf16.mxu1 %v6116_v28 }
  0x4b   :  { %5811 = vmatmul.mubr.bf16.vlgmr.msra.gmra.mxu0 %v62_v29  ;;  %352 = vmatmul.mubr.bf16.vlgmr.msra.gmra.mxu1 %v62_v29 }
  0x4c   :  { %5818 = vmatprep.mubr.msk.f32.mxu0 %vm6306_vm0, %v6305_v0  ;;  %363 = vmatpush1.bf16.msra.mxu1 %v6114_v30 }
  0x4d   :  { %394 = vmatprep.mubr.bf16.mxu1 %v6307_v1  ;;  %364 = vmatprep.subr.bf16.mxu1 %v6119_v31 }
  0x50   :  { %365 = vmatpush1.bf16.msra.mxu1 %v6117_v32 }
  0x51   :  { %366 = vmatprep.subr.bf16.mxu1 %v6122_v33 }
  0x54   :  { %367 = vmatpush1.bf16.msra.mxu1 %v6120_v34 }
  0x55   :  { %368 = vmatprep.subr.bf16.mxu1 %v6125_v35 }
  0x58   :  { %369 = vmatpush1.bf16.msra.mxu1 %v6123_v36 }
  0x59   :  { %370 = vmatprep.subr.bf16.mxu1 %v6128_v37 }
  0x5c   :  { %371 = vmatpush1.bf16.msra.mxu1 %v6126_v38 }
  0x5d   :  { %372 = vmatprep.subr.bf16.mxu1 %v6131_v39 }
  0x60   :  { %373 = vmatpush1.bf16.msra.mxu1 %v6129_v40 }
  0x61   :  { %374 = vmatprep.subr.bf16.mxu1 %v6134_v41 }
  0x64   :  { %375 = vmatpush1.bf16.msra.mxu1 %v6132_v42 }
  0x65   :  { %376 = vmatprep.subr.bf16.mxu1 %v6137_v43 }
  0x68   :  { %377 = vmatpush1.bf16.msra.mxu1 %v6135_v44 }
  0x69   :  { %5835 = vmatprep.subr.mxu1 %v6305_v0 }
  0x6b   :  { %395 = vmatmul.mubr.bf16.vlgmr.msra.gmra.mxu1 %v62_v29 }
  0x6c   :  { %5839 = vmatprep.mubr.msk.f32.mxu1 %vm6306_vm0, %v6305_v0 }
 0x10b   :  { %v439_v45 = vpop.f32.mrf.mxu0  ;;  %v353_v46 = vpop.f32.mrf.mxu1 }
 0x10c   :  { %v453_v60 = vmul.f32 %v5591_v48, %v353_v46 }
 0x10d   :  { %v5812_v47 = vpop.f32.mrf.mxu0  ;;  %v355_v49 = vpop.f32.mrf.mxu1 }
 0x10e   :  { %v457_v50 = vmul.f32 %v5591_v48, %v355_v49 }
 0x10f   :  { %v442_v51 = vpop.f32.mrf.mxu0  ;;  %v357_v52 = vpop.f32.mrf.mxu1 }
 0x110   :  { %v459_v53 = vadd.f32 %v457_v50, %v439_v45  ;;  %v6377_v54 = vmul.f32 %v5591_v48, %v357_v52 }
 0x111   :  { %v5813_v55 = vpop.f32.mrf.mxu0  ;;  %v359_v56 = vpop.f32.mrf.mxu1 }
 0x112   :  { %v458_v57 = vmul.f32 %v5591_v48, %v359_v56  ;;  %486 = vrot.lane.b32.xlu1 %v459_v53, %s6303_s5  ;;  %483 = vrot.lane.b32.xlu0 %v459_v53, %s6308_s9 }
 0x114   :  { %v6381_v58 = vadd.f32 %v458_v57, %v442_v51 }
 0x116   :  { %480 = vrot.lane.b32.xlu1 %v459_v53, %s6309_s10  ;;  %477 = vrot.lane.b32.xlu0 %v459_v53, %s6310_s3 }
 0x11a   :  { %492 = vrot.lane.b32.xlu1 %v459_v53, %s6311_s11  ;;  %489 = vrot.lane.b32.xlu0 %v459_v53, %s6312_s12 }
 0x11e   :  { %495 = vrot.lane.b32.xlu0 %v459_v53, %s6313_s13 }
 0x12b   :  { %v6388_v59 = vpop.f32.mrf.mxu1 }
 0x12d   :  { %v398_v61 = vpop.f32.mrf.mxu1 }
 0x12e   :  { %v455_v62 = vadd.f32 %v453_v60, %v398_v61 }
 0x12f   :  { %v6450_v40 = vpop.f32.mrf.mxu1 }
 0x130   :  { %466 = vrot.lane.b32.xlu1 %v455_v62, %s6308_s9 }
 0x131   :  { %v402_v42 = vpop.f32.mrf.mxu1 }
 0x134   :  { %468 = vrot.lane.b32.xlu1 %v455_v62, %s6303_s5 }
 0x138   :  { %470 = vrot.lane.b32.xlu1 %v455_v62, %s6312_s12 }
 0x13c   :  { %520 = vxpose.xlu0.b32.start.end [1/1] (short) (narrow) %v459_v53, 16  ;;  %474 = vrot.lane.b32.xlu1 %v455_v62, %s6313_s13 }
 0x169   :  { %462 = vrot.lane.b32.xlu0 %v455_v62, %s6310_s3 }
 0x16d   :  { %464 = vrot.lane.b32.xlu0 %v455_v62, %s6309_s10 }
 0x171   :  { %472 = vrot.lane.b32.xlu0 %v455_v62, %s6311_s11 }
 0x184   :  { %v484_v63 = vpop.permute.xlu0 %483  ;;  %v487_v4 = vpop.permute.xlu1 %486 }
 0x185   :  { %616 = vxpose.xlu1.b32.start.end [1/1] (short) (narrow) %v484_v63, 16 }
 0x188   :  { %v478_v1 = vpop.permute.xlu0 %477  ;;  %v481_v5 = vpop.permute.xlu1 %480 }
 0x18c   :  { %v490_v2 = vpop.permute.xlu0 %489  ;;  %v493_v6 = vpop.permute.xlu1 %492 }
 0x18d   :  { %680 = vxpose.xlu1.b32.start.end [1/1] (short) (narrow) %v490_v2, 16 }
 0x18f   :  { %552 = vxpose.xlu0.b32.start.end [1/1] (short) (narrow) %v478_v1, 16 }
 0x190   :  { %v496_v3 = vpop.permute.xlu0 %495 }
 0x192   :  { %744 = vxpose.xlu1.b32.start.end [1/1] (short) (narrow) %v496_v3, 16 }
 0x194   :  { %648 = vxpose.xlu0.b32.start.end [1/1] (short) (narrow) %v487_v4, 16 }
 0x199   :  { %584 = vxpose.xlu0.b32.start.end [1/1] (short) (narrow) %v481_v5, 16 }
 0x19e   :  { %712 = vxpose.xlu0.b32.start.end [1/1] (short) (narrow) %v493_v6, 16 }
 0x1a2   :  { %v467_v9 = vpop.permute.xlu1 %466 }
 0x1a6   :  { %v469_v10 = vpop.permute.xlu1 %468 }
 0x1aa   :  { %v471_v11 = vpop.permute.xlu1 %470 }
 0x1ae   :  { %v475_v13 = vpop.permute.xlu1 %474 }
 0x1b4   :  { %502 = vrot.lane.b32.xlu1 %v6388_v59, %s6309_s10 }
 0x1b8   :  { %v536_v7 = vpop.trf.xlu0  ;;  %511 = vrot.lane.b32.xlu1 %v6388_v59, %s6312_s12 }
 0x1bc   :  { %v537_v8 = vpop.trf.xlu0  ;;  %517 = vrot.lane.b32.xlu1 %v6388_v59, %s6313_s13 }
 0x1bd   :  { %5815 = vmatpush3.msra.mxu0 %v537_v8 }
 0x1be   :  { %5816 = vmatprep.subr.mxu0 %v6305_v0 }
 0x1bf   :  { %5817 = vmatpush3.msra.mxu0 %v536_v7 }
 0x1c0   :  { %2969 = vrot.lane.b32.xlu1 %v6381_v58, %s6308_s9  ;;  %5819 = vmatmul.mubr.msk.f32.vlgmr.msra.gmra.mxu0 %vm776_vm1, %v455_v62 }
 0x1c1   :  { %5821 = vmatprep.subr.mxu0 %v6305_v0  ;;  %5825 = vmatprep.mubr.msk.f32.mxu0 %vm6306_vm0, %v6305_v0 }
 0x1cb   :  { %499 = vrot.lane.b32.xlu0 %v6388_v59, %s6310_s3 }
 0x1cf   :  { %505 = vrot.lane.b32.xlu0 %v6388_v59, %s6308_s9 }
 0x1d3   :  { %508 = vrot.lane.b32.xlu0 %v6388_v59, %s6303_s5 }
 0x1db   :  { %v463_v12 = vpop.permute.xlu0 %462 }
 0x1df   :  { %v465_v14 = vpop.permute.xlu0 %464 }
 0x1e3   :  { %v473_v17 = vpop.permute.xlu0 %472 }
 0x1f1   :  { %1450 = vxpose.xlu0.b32.start.end [1/1] (short) (narrow) %v6388_v59, 16 }
 0x201   :  { %v632_v15 = vpop.trf.xlu1 }
 0x205   :  { %v633_v16 = vpop.trf.xlu1 }
 0x206   :  { %5836 = vmatpush3.msra.mxu1 %v633_v16 }
 0x207   :  { %5837 = vmatprep.subr.mxu1 %v6305_v0 }
 0x208   :  { %5838 = vmatpush3.msra.mxu1 %v632_v15 }
 0x209   :  { %5840 = vmatmul.mubr.msk.f32.vlgmr.msra.gmra.mxu1 %vm776_vm1, %v467_v9  ;;  %5842 = vmatprep.subr.mxu1 %v6305_v0  ;;  %v696_v19 = vpop.trf.xlu1 }
 0x20a   :  { %5846 = vmatprep.mubr.msk.f32.mxu1 %vm6306_vm0, %v6305_v0 }
 0x20b   :  { %v568_v18 = vpop.trf.xlu0 }
 0x20d   :  { %v697_v22 = vpop.trf.xlu1 }
 0x20f   :  { %v569_v20 = vpop.trf.xlu0 }
 0x210   :  { %5822 = vmatpush3.msra.mxu0 %v569_v20 }
 0x211   :  { %5823 = vmatprep.subr.mxu0 %v6305_v0  ;;  %v760_v24 = vpop.trf.xlu1 }
 0x212   :  { %5824 = vmatpush3.msra.mxu0 %v568_v18 }
 0x213   :  { %v664_v21 = vpop.trf.xlu0  ;;  %5826 = vmatmul.mubr.msk.f32.vlgmr.msra.gmra.mxu0 %vm776_vm1, %v463_v12  ;;  %5828 = vmatprep.subr.mxu0 %v6305_v0 }
 0x214   :  { %5832 = vmatprep.mubr.msk.f32.mxu0 %vm6306_vm0, %v6305_v0 }
 0x215   :  { %v761_v27 = vpop.trf.xlu1 }
 0x217   :  { %v665_v23 = vpop.trf.xlu0 }
 0x218   :  { %5843 = vmatpush3.msra.mxu1 %v665_v23 }
 0x219   :  { %5844 = vmatprep.subr.mxu1 %v6305_v0 }
 0x21a   :  { %5845 = vmatpush3.msra.mxu1 %v664_v21 }
 0x21b   :  { %v600_v25 = vpop.trf.xlu0  ;;  %5847 = vmatmul.mubr.msk.f32.vlgmr.msra.gmra.mxu1 %vm776_vm1, %v469_v10  ;;  %5849 = vmatprep.subr.mxu1 %v6305_v0 }
 0x21c   :  { %5850 = vmatpush3.msra.mxu1 %v697_v22  ;;  %5853 = vmatprep.mubr.msk.f32.mxu1 %vm6306_vm0, %v6305_v0 }
 0x21d   :  { %5851 = vmatprep.subr.mxu1 %v6305_v0 }
 0x21e   :  { %5852 = vmatpush3.msra.mxu1 %v696_v19 }
 0x21f   :  { %v601_v26 = vpop.trf.xlu0  ;;  %5854 = vmatmul.mubr.msk.f32.vlgmr.msra.gmra.mxu1 %vm776_vm1, %v471_v11  ;;  %5856 = vmatprep.subr.mxu1 %v6305_v0 }
 0x220   :  { %5829 = vmatpush3.msra.mxu0 %v601_v26  ;;  %5860 = vmatprep.mubr.msk.f32.mxu1 %vm6306_vm0, %v6305_v0 }
 0x221   :  { %5830 = vmatprep.subr.mxu0 %v6305_v0 }
 0x222   :  { %5831 = vmatpush3.msra.mxu0 %v600_v25 }
 0x223   :  { %v728_v28 = vpop.trf.xlu0  ;;  %5833 = vmatmul.mubr.msk.f32.vlgmr.msra.gmra.mxu0 %vm776_vm1, %v465_v14 }
 0x226   :  { %v503_v29 = vpop.permute.xlu1 %502 }
 0x227   :  { %v729_v30 = vpop.trf.xlu0  ;;  %1514 = vxpose.xlu0.b32.start.end [1/1] (short) (narrow) %v503_v29, 16 }
 0x228   :  { %5857 = vmatpush3.msra.mxu1 %v729_v30 }
 0x229   :  { %5858 = vmatprep.subr.mxu1 %v6305_v0 }
 0x22a   :  { %5859 = vmatpush3.msra.mxu1 %v728_v28  ;;  %v6448_v39 = vpop.permute.xlu1 %511 }
 0x22b   :  { %5861 = vmatmul.mubr.msk.f32.vlgmr.msra.gmra.mxu1 %vm776_vm1, %v473_v17  ;;  %5863 = vmatprep.subr.mxu1 %v6305_v0 }
 0x22c   :  { %5864 = vmatpush3.msra.mxu1 %v761_v27  ;;  %5867 = vmatprep.mubr.msk.f32.mxu1 %vm6306_vm0, %v6305_v0 }
 0x22d   :  { %5865 = vmatprep.subr.mxu1 %v6305_v0 }
 0x22e   :  { %5866 = vmatpush3.msra.mxu1 %v760_v24  ;;  %v6452_v41 = vpop.permute.xlu1 %517 }
 0x22f   :  { %5868 = vmatmul.mubr.msk.f32.vlgmr.msra.gmra.mxu1 %vm776_vm1, %v475_v13  ;;  %v6484_v13 = vadd.f32 %v6377_v54, %v402_v42 }
 0x232   :  { %v6454_v43 = vpop.permute.xlu1 %2969 }
 0x23d   :  { %v500_v31 = vpop.permute.xlu0 %499 }
 0x23e   :  { %1482 = vxpose.xlu1.b32.start.end [1/1] (short) (narrow) %v500_v31, 16 }
 0x241   :  { %v506_v32 = vpop.permute.xlu0 %505 }
 0x243   :  { %1546 = vxpose.xlu1.b32.start.end [1/1] (short) (narrow) %v506_v32, 16 }
 0x245   :  { %v509_v33 = vpop.permute.xlu0 %508 }
 0x26d   :  { %v1466_v34 = vpop.trf.xlu0 }
 0x26e   :  { %5872 = vmatprep.mubr.msk.f32.mxu0 %vm1361_vm2, %v1466_v34 }
 0x271   :  { %v6488_v14 = vpop.trf.xlu0 }
 0x280   :  { %v845_v35 = vpop.f32.mrf.mxu0 }
 0x281   :  { %v1353_v36 = vmul.f32 0.25, %v845_v35 }
 0x282   :  { %v5820_v37 = vpop.f32.mrf.mxu0 }
 0x283   :  { %v1362_v38 = vsel %vm1361_vm2, %v1353_v36, -inf }
 0x284   :  { %1363 = vmax.xlane.f32.xlu0 %v1362_v38 }
 0x2a3   :  { %v6492_v15 = vpop.trf.xlu0 }
 0x2a7   :  { %v6498_v16 = vpop.trf.xlu0 }
 0x2ba   :  { %v1498_v46 = vpop.trf.xlu1 }
 0x2bb   :  { %5877 = vmatprep.mubr.msk.f32.mxu1 %vm1361_vm2, %v1498_v46 }
 0x2be   :  { %v6508_v21 = vpop.trf.xlu1 }
 0x2c2   :  { %v6512_v22 = vpop.trf.xlu1 }
 0x2c6   :  { %v6518_v23 = vpop.trf.xlu1 }
 0x2c9   :  { %v1061_v44 = vpop.f32.mrf.mxu1 }
 0x2ca   :  { %v6457_v50 = vmul.f32 0.25, %v1061_v44 }
 0x2cb   :  { %v5841_v45 = vpop.f32.mrf.mxu1 }
 0x2cc   :  { %v1371_v52 = vsel %vm1361_vm2, %v6457_v50, -inf }
 0x2d3   :  { %v917_v47 = vpop.f32.mrf.mxu0 }
 0x2d4   :  { %v1354_v48 = vmul.f32 0.25, %v917_v47 }
 0x2d5   :  { %v5827_v49 = vpop.f32.mrf.mxu0 }
 0x2d6   :  { %v1365_v51 = vsel %vm1361_vm2, %v1354_v48, -inf }
 0x2d7   :  { %1366 = vmax.xlane.f32.xlu1 %v1365_v51 }
 0x2db   :  { %1372 = vmax.xlane.f32.xlu1 %v1371_v52  ;;  %v1133_v53 = vpop.f32.mrf.mxu1 }
 0x2dc   :  { %v6462_v55 = vmul.f32 0.25, %v1133_v53 }
 0x2dd   :  { %v5848_v56 = vpop.f32.mrf.mxu1 }
 0x2de   :  { %v1374_v57 = vsel %vm1361_vm2, %v6462_v55, -inf }
 0x2df   :  { %1375 = vmax.xlane.f32.xlu0 %v1374_v57  ;;  %v1205_v60 = vpop.f32.mrf.mxu1 }
 0x2e0   :  { %v6466_v2 = vmul.f32 0.25, %v1205_v60 }
 0x2e1   :  { %v5855_v61 = vpop.f32.mrf.mxu1 }
 0x2e2   :  { %v1377_v4 = vsel %vm1361_vm2, %v6466_v2, -inf }
 0x2e3   :  { %v989_v62 = vpop.f32.mrf.mxu0 }
 0x2e4   :  { %v1355_v63 = vmul.f32 0.25, %v989_v62 }
 0x2e5   :  { %v5834_v1 = vpop.f32.mrf.mxu0 }
 0x2e6   :  { %v1368_v3 = vsel %vm1361_vm2, %v1355_v63, -inf }
 0x2e7   :  { %1369 = vmax.xlane.f32.xlu1 %v1368_v3 }
 0x2eb   :  { %1378 = vmax.xlane.f32.xlu1 %v1377_v4  ;;  %v1277_v5 = vpop.f32.mrf.mxu1 }
 0x2ec   :  { %v6471_v6 = vmul.f32 0.25, %v1277_v5 }
 0x2ed   :  { %v5862_v7 = vpop.f32.mrf.mxu1 }
 0x2ee   :  { %v1380_v8 = vsel %vm1361_vm2, %v6471_v6, -inf }
 0x2ef   :  { %1381 = vmax.xlane.f32.xlu0 %v1380_v8  ;;  %v1349_v9 = vpop.f32.mrf.mxu1 }
 0x2f0   :  { %v6475_v10 = vmul.f32 0.25, %v1349_v9 }
 0x2f1   :  { %v5869_v11 = vpop.f32.mrf.mxu1 }
 0x2f2   :  { %v1383_v12 = vsel %vm1361_vm2, %v6475_v10, -inf }
 0x2f3   :  { %1384 = vmax.xlane.f32.xlu1 %v1383_v12 }
 0x304   :  { %2972 = vrot.lane.b32.xlu1 %v6381_v58, %s6303_s5 }
 0x308   :  { %2978 = vrot.lane.b32.xlu1 %v6381_v58, %s6311_s11 }
 0x30c   :  { %2948 = vrot.lane.b32.xlu1 %v6484_v13, %s6310_s3 }
 0x30d   :  { %v1364_v54 = vpop.xlane.xlu0 %1363 }
 0x30e   :  { %v1386_v17 = vsub.f32 %v1353_v36, %v1364_v54 }
 0x310   :  { %2952 = vrot.lane.b32.xlu1 %v6484_v13, %s6308_s9  ;;  %v1394_v18 = vmul.f32 1.442695, %v1386_v17 }
 0x312   :  { %6146 = vpow2.f32 %v1394_v18 }
 0x314   :  { %2956 = vrot.lane.b32.xlu1 %v6484_v13, %s6312_s12 }
 0x318   :  { %2960 = vrot.lane.b32.xlu1 %v6484_v13, %s6313_s13 }
 0x31c   :  { %1578 = vxpose.xlu0.b32.start.end [1/1] (short) (narrow) %v509_v33, 16 }
 0x31f   :  { %v6500_v19 = vpop.eup %6146 }
 0x320   :  { %v1410_v20 = vsel %vm1361_vm2, %v6500_v19, 0.0 }
 0x33c   :  { %1411 = vadd.xlane.f32.xlu1 %v1410_v20 }
 0x349   :  { %514 = vrot.lane.b32.xlu0 %v6388_v59, %s6311_s11 }
 0x34d   :  { %2963 = vrot.lane.b32.xlu0 %v6381_v58, %s6310_s3 }
 0x351   :  { %2966 = vrot.lane.b32.xlu0 %v6381_v58, %s6309_s10 }
 0x355   :  { %2975 = vrot.lane.b32.xlu0 %v6381_v58, %s6312_s12 }
 0x359   :  { %2981 = vrot.lane.b32.xlu0 %v6381_v58, %s6313_s13 }
 0x35d   :  { %2950 = vrot.lane.b32.xlu0 %v6484_v13, %s6309_s10 }
 0x360   :  { %v1367_v59 = vpop.xlane.xlu1 %1366 }
 0x361   :  { %v1387_v24 = vsub.f32 %v1354_v48, %v1367_v59  ;;  %2954 = vrot.lane.b32.xlu0 %v6484_v13, %s6303_s5 }
 0x363   :  { %v1396_v25 = vmul.f32 1.442695, %v1387_v24 }
 0x364   :  { %v1373_v26 = vpop.xlane.xlu1 %1372 }
 0x365   :  { %6148 = vpow2.f32 %v1396_v25  ;;  %v1389_v27 = vsub.f32 %v6457_v50, %v1373_v26  ;;  %2958 = vrot.lane.b32.xlu0 %v6484_v13, %s6311_s11 }
 0x367   :  { %v1400_v28 = vmul.f32 1.442695, %v1389_v27 }
 0x368   :  { %v1376_v29 = vpop.xlane.xlu0 %1375 }
 0x369   :  { %6150 = vpow2.f32 %v1400_v28  ;;  %v1390_v30 = vsub.f32 %v6462_v55, %v1376_v29 }
 0x36b   :  { %v1402_v34 = vmul.f32 1.442695, %v1390_v30 }
 0x370   :  { %v1370_v31 = vpop.xlane.xlu1 %1369 }
 0x371   :  { %v1388_v32 = vsub.f32 %v1355_v63, %v1370_v31 }
 0x372   :  { %v6528_v33 = vpop.eup %6148 }
 0x373   :  { %v1398_v35 = vmul.f32 1.442695, %v1388_v32  ;;  %v1413_v36 = vsel %vm1361_vm2, %v6528_v33, 0.0 }
 0x374   :  { %v1379_v37 = vpop.xlane.xlu1 %1378  ;;  %1414 = vadd.xlane.f32.xlu1 %v1413_v36 }
 0x375   :  { %6152 = vpow2.f32 %v1398_v35  ;;  %v1391_v38 = vsub.f32 %v6466_v2, %v1379_v37 }
 0x376   :  { %v6533_v42 = vpop.eup %6150  ;;  %6154 = vpow2.f32 %v1402_v34 }
 0x377   :  { %v1404_v44 = vmul.f32 1.442695, %v1391_v38  ;;  %v1419_v45 = vsel %vm1361_vm2, %v6533_v42, 0.0 }
 0x378   :  { %v1382_v46 = vpop.xlane.xlu0 %1381  ;;  %1420 = vadd.xlane.f32.xlu1 %v1419_v45 }
 0x379   :  { %6156 = vpow2.f32 %v1404_v44  ;;  %v1392_v47 = vsub.f32 %v6471_v6, %v1382_v46 }
 0x37b   :  { %v1406_v48 = vmul.f32 1.442695, %v1392_v47 }
 0x37c   :  { %v1385_v49 = vpop.xlane.xlu1 %1384 }
 0x37d   :  { %6158 = vpow2.f32 %v1406_v48  ;;  %v1393_v50 = vsub.f32 %v6475_v10, %v1385_v49 }
 0x37f   :  { %v1408_v51 = vmul.f32 1.442695, %v1393_v50 }
 0x380   :  { %v2973_v2 = vpop.permute.xlu1 %2972 }
 0x381   :  { %6160 = vpow2.f32 %v1408_v51 }
 0x382   :  { %v6539_v52 = vpop.eup %6152 }
 0x383   :  { %v1416_v53 = vsel %vm1361_vm2, %v6539_v52, 0.0  ;;  %v6543_v55 = vpop.eup %6154 }
 0x384   :  { %1417 = vadd.xlane.f32.xlu0 %v1416_v53  ;;  %v1422_v57 = vsel %vm1361_vm2, %v6543_v55, 0.0  ;;  %v2979_v3 = vpop.permute.xlu1 %2978 }
 0x386   :  { %v6545_v56 = vpop.eup %6156 }
 0x387   :  { %v1425_v60 = vsel %vm1361_vm2, %v6545_v56, 0.0 }
 0x388   :  { %1423 = vadd.xlane.f32.xlu0 %v1422_v57  ;;  %1426 = vadd.xlane.f32.xlu1 %v1425_v60  ;;  %v6559_v4 = vpop.permute.xlu1 %2948 }
 0x38a   :  { %v6551_v61 = vpop.eup %6158 }
 0x38b   :  { %v1428_v62 = vsel %vm1361_vm2, %v6551_v61, 0.0 }
 0x38c   :  { %1429 = vadd.xlane.f32.xlu1 %v1428_v62  ;;  %v6563_v6 = vpop.permute.xlu1 %2952 }
 0x38e   :  { %v6555_v63 = vpop.eup %6160 }
 0x38f   :  { %v1431_v1 = vsel %vm1361_vm2, %v6555_v63, 0.0 }
 0x390   :  { %1432 = vadd.xlane.f32.xlu0 %v1431_v1  ;;  %v6567_v8 = vpop.permute.xlu1 %2956 }
 0x394   :  { %v6570_v11 = vpop.permute.xlu1 %2960 }
 0x398   :  { %v6561_v5 = vpop.trf.xlu0 }
 0x39c   :  { %v6565_v7 = vpop.trf.xlu0 }
 0x3bb   :  { %v515_v9 = vpop.permute.xlu0 %514 }
 0x3bd   :  { %1642 = vxpose.xlu0.b32.start.end [1/1] (short) (narrow) %v515_v9, 16 }
 0x3bf   :  { %1610 = vxpose.xlu1.b32.start.end [1/1] (short) (narrow) %v6448_v39, 16  ;;  %v2964_v10 = vpop.permute.xlu0 %2963 }
 0x3c2   :  { %1674 = vxpose.xlu0.b32.start.end [1/1] (short) (narrow) %v6452_v41, 16 }
 0x3c3   :  { %v2967_v54 = vpop.permute.xlu0 %2966 }
 0x3c4   :  { %3038 = vxpose.xlu1.b32.start.end [1/1] (short) (narrow) %v2964_v10, 16 }
 0x3c5   :  { %v1412_v12 = vpop.xlane.xlu1 %1411 }
 0x3c6   :  { %6162 = vrcp.f32 %v1412_v12 }
 0x3c7   :  { %3006 = vxpose.xlu0.b32.start.end [1/1] (short) (narrow) %v6381_v58, 16  ;;  %v2976_v17 = vpop.permute.xlu0 %2975 }
 0x3c9   :  { %3102 = vxpose.xlu1.b32.start.end [1/1] (short) (narrow) %v6454_v43, 16 }
 0x3cb   :  { %v2982_v18 = vpop.permute.xlu0 %2981 }
 0x3cc   :  { %3070 = vxpose.xlu0.b32.start.end [1/1] (short) (narrow) %v2967_v54, 16 }
 0x3ce   :  { %3166 = vxpose.xlu1.b32.start.end [1/1] (short) (narrow) %v2976_v17, 16 }
 0x3cf   :  { %v6585_v58 = vpop.permute.xlu0 %2950 }
 0x3d1   :  { %3134 = vxpose.xlu0.b32.start.end [1/1] (short) (narrow) %v2973_v2, 16 }
 0x3d3   :  { %v6163_v20 = vpop.eup %6162  ;;  %3230 = vxpose.xlu1.b32.start.end [1/1] (short) (narrow) %v2982_v18, 16 }
 0x3d4   :  { %v1442_v39 = vmul.f32 %v6163_v20, %v6500_v19  ;;  %v6587_v19 = vpop.permute.xlu0 %2954 }
 0x3d6   :  { %3198 = vxpose.xlu0.b32.start.end [1/1] (short) (narrow) %v2979_v3, 16  ;;  %5870 = vmatprep.subr.msk.mxu0 %vm1361_vm2, %v1442_v39 }
 0x3d7   :  { %5871 = vmatpush3.xpose.msk.msra.mxu0 %vm1361_vm2, %v1442_v39 }
 0x3d8   :  { %3934 = vxpose.xlu1.b32.start.end [1/1] (short) (narrow) %v6450_v40, 16  ;;  %v6589_v59 = vpop.permute.xlu0 %2958 }
 0x3da   :  { %5873 = vmatmul.mubr.msk.f32.vlgmr.msra.gmra.mxu0 %vm1361_vm2, %v6488_v14 }
 0x3db   :  { %5882 = vmatprep.mubr.msk.f32.mxu0 %vm1361_vm2, %v6492_v15 }
 0x3fa   :  { %2985 = vrot.lane.b32.xlu1 %v6450_v40, %s6310_s3 }
 0x3fd   :  { %v1415_v41 = vpop.xlane.xlu1 %1414 }
 0x3fe   :  { %6164 = vrcp.f32 %v1415_v41 }
 0x401   :  { %v1421_v43 = vpop.xlane.xlu1 %1420 }
 0x402   :  { %6166 = vrcp.f32 %v1421_v43 }
 0x40b   :  { %v6165_v24 = vpop.eup %6164 }
 0x40c   :  { %v1443_v25 = vmul.f32 %v6165_v24, %v6528_v33 }
 0x40d   :  { %v1418_v14 = vpop.xlane.xlu0 %1417 }
 0x40e   :  { %6168 = vrcp.f32 %v1418_v14  ;;  %5875 = vmatprep.subr.msk.mxu1 %vm1361_vm2, %v1443_v25 }
 0x40f   :  { %v6167_v15 = vpop.eup %6166  ;;  %5876 = vmatpush3.xpose.msk.msra.mxu1 %vm1361_vm2, %v1443_v25 }
 0x410   :  { %v1445_v26 = vmul.f32 %v6167_v15, %v6533_v42 }
 0x411   :  { %v1424_v27 = vpop.xlane.xlu0 %1423  ;;  %v1427_v28 = vpop.xlane.xlu1 %1426 }
 0x412   :  { %6170 = vrcp.f32 %v1424_v27  ;;  %5878 = vmatmul.mubr.msk.f32.vlgmr.msra.gmra.mxu1 %vm1361_vm2, %v6508_v21  ;;  %5885 = vmatprep.subr.msk.mxu1 %vm1361_vm2, %v1445_v26 }
 0x413   :  { %6172 = vrcp.f32 %v1427_v28  ;;  %5886 = vmatpush3.xpose.msk.msra.mxu1 %vm1361_vm2, %v1445_v26  ;;  %5887 = vmatprep.mubr.msk.f32.mxu1 %vm1361_vm2, %v6512_v22 }
 0x415   :  { %v1430_v29 = vpop.xlane.xlu1 %1429 }
 0x416   :  { %6174 = vrcp.f32 %v1430_v29  ;;  %5888 = vmatmul.mubr.msk.f32.vlgmr.msra.gmra.mxu1 %vm1361_vm2, %v6518_v23 }
 0x419   :  { %v1433_v30 = vpop.xlane.xlu0 %1432 }
 0x41a   :  { %6176 = vrcp.f32 %v1433_v30 }
 0x41b   :  { %v6169_v31 = vpop.eup %6168 }
 0x41c   :  { %v1444_v32 = vmul.f32 %v6169_v31, %v6539_v52 }
 0x41e   :  { %5880 = vmatprep.subr.msk.mxu0 %vm1361_vm2, %v1444_v32 }
 0x41f   :  { %v6171_v21 = vpop.eup %6170  ;;  %5881 = vmatpush3.xpose.msk.msra.mxu0 %vm1361_vm2, %v1444_v32 }
 0x420   :  { %v6173_v33 = vpop.eup %6172  ;;  %v1446_v34 = vmul.f32 %v6171_v21, %v6543_v55 }
 0x421   :  { %v1447_v22 = vmul.f32 %v6173_v33, %v6545_v56 }
 0x422   :  { %5883 = vmatmul.mubr.msk.f32.vlgmr.msra.gmra.mxu0 %vm1361_vm2, %v6498_v16  ;;  %5890 = vmatprep.subr.msk.mxu0 %vm1361_vm2, %v1446_v34 }
 0x423   :  { %v6175_v23 = vpop.eup %6174  ;;  %5895 = vmatprep.subr.msk.mxu1 %vm1361_vm2, %v1447_v22  ;;  %5891 = vmatpush3.xpose.msk.msra.mxu0 %vm1361_vm2, %v1446_v34 }
 0x424   :  { %5892 = vmatprep.mubr.msk.f32.mxu0 %vm1361_vm2, %v6561_v5  ;;  %5896 = vmatpush3.xpose.msk.msra.mxu1 %vm1361_vm2, %v1447_v22  ;;  %v1448_v35 = vmul.f32 %v6175_v23, %v6551_v61 }
 0x426   :  { %5893 = vmatmul.mubr.msk.f32.vlgmr.msra.gmra.mxu0 %vm1361_vm2, %v6565_v7  ;;  %5900 = vmatprep.subr.msk.mxu0 %vm1361_vm2, %v1448_v35 }
 0x427   :  { %v6177_v16 = vpop.eup %6176  ;;  %5901 = vmatpush3.xpose.msk.msra.mxu0 %vm1361_vm2, %v1448_v35 }
 0x428   :  { %v1449_v36 = vmul.f32 %v6177_v16, %v6555_v63  ;;  %5910 = vmatprep.subr.mxu0 %v6305_v0 }
 0x42a   :  { %5905 = vmatprep.subr.msk.mxu1 %vm1361_vm2, %v1449_v36 }
 0x439   :  { %v1658_v37 = vpop.trf.xlu0 }
 0x43a   :  { %5902 = vmatprep.mubr.msk.f32.mxu0 %vm1361_vm2, %v1658_v37 }
 0x43b   :  { %v1626_v38 = vpop.trf.xlu1 }
 0x43c   :  { %5897 = vmatprep.mubr.msk.f32.mxu1 %vm1361_vm2, %v1626_v38 }
 0x43d   :  { %v1659_v42 = vpop.trf.xlu0 }
 0x43e   :  { %5903 = vmatmul.mubr.msk.f32.vlgmr.msra.gmra.mxu0 %vm1361_vm2, %v1659_v42 }
 0x43f   :  { %v1627_v44 = vpop.trf.xlu1  ;;  %5914 = vmatprep.mubr.msk.f32.mxu0 %vm6306_vm0, %v6305_v0 }
 0x440   :  { %5898 = vmatmul.mubr.msk.f32.vlgmr.msra.gmra.mxu1 %vm1361_vm2, %v1627_v44 }
 0x441   :  { %5906 = vmatpush3.xpose.msk.msra.mxu1 %vm1361_vm2, %v1449_v36  ;;  %v1690_v45 = vpop.trf.xlu0 }
 0x442   :  { %5907 = vmatprep.mubr.msk.f32.mxu1 %vm1361_vm2, %v1690_v45  ;;  %5917 = vmatprep.subr.mxu1 %v6305_v0 }
 0x443   :  { %v3054_v46 = vpop.trf.xlu1 }
 0x445   :  { %v1691_v47 = vpop.trf.xlu0 }
 0x446   :  { %5908 = vmatmul.mubr.msk.f32.vlgmr.msra.gmra.mxu1 %vm1361_vm2, %v1691_v47 }
 0x447   :  { %v3055_v48 = vpop.trf.xlu1  ;;  %5921 = vmatprep.mubr.msk.f32.mxu1 %vm6306_vm0, %v6305_v0 }
 0x448   :  { %5918 = vmatpush3.msra.mxu1 %v3055_v48 }
 0x449   :  { %v3022_v49 = vpop.trf.xlu0  ;;  %5919 = vmatprep.subr.mxu1 %v6305_v0 }
 0x44a   :  { %5920 = vmatpush3.msra.mxu1 %v3054_v46 }
 0x44b   :  { %5922 = vmatmul.mubr.msk.f32.vlgmr.msra.gmra.mxu1 %vm776_vm1, %v6559_v4  ;;  %v3118_v50 = vpop.trf.xlu1  ;;  %5931 = vmatprep.subr.mxu1 %v6305_v0 }
 0x44c   :  { %5935 = vmatprep.mubr.msk.f32.mxu1 %vm6306_vm0, %v6305_v0 }
 0x44d   :  { %v3023_v51 = vpop.trf.xlu0 }
 0x44e   :  { %5911 = vmatpush3.msra.mxu0 %v3023_v51 }
 0x44f   :  { %5912 = vmatprep.subr.mxu0 %v6305_v0  ;;  %v3119_v52 = vpop.trf.xlu1 }
 0x450   :  { %5913 = vmatpush3.msra.mxu0 %v3022_v49  ;;  %5932 = vmatpush3.msra.mxu1 %v3119_v52 }
 0x451   :  { %v3086_v53 = vpop.trf.xlu0  ;;  %5915 = vmatmul.mubr.msk.f32.vlgmr.msra.gmra.mxu0 %vm776_vm1, %v6484_v13  ;;  %5933 = vmatprep.subr.mxu1 %v6305_v0 }
 0x452   :  { %5934 = vmatpush3.msra.mxu1 %v3118_v50  ;;  %5924 = vmatprep.subr.mxu0 %v6305_v0 }
 0x453   :  { %5936 = vmatmul.mubr.msk.f32.vlgmr.msra.gmra.mxu1 %vm776_vm1, %v6563_v6  ;;  %v3182_v55 = vpop.trf.xlu1  ;;  %5945 = vmatprep.subr.mxu1 %v6305_v0 }
 0x454   :  { %5928 = vmatprep.mubr.msk.f32.mxu0 %vm6306_vm0, %v6305_v0  ;;  %5949 = vmatprep.mubr.msk.f32.mxu1 %vm6306_vm0, %v6305_v0 }
 0x455   :  { %v3087_v56 = vpop.trf.xlu0 }
 0x456   :  { %5925 = vmatpush3.msra.mxu0 %v3087_v56 }
 0x457   :  { %5926 = vmatprep.subr.mxu0 %v6305_v0  ;;  %v3183_v13 = vpop.trf.xlu1 }
 0x458   :  { %5927 = vmatpush3.msra.mxu0 %v3086_v53  ;;  %5946 = vmatpush3.msra.mxu1 %v3183_v13 }
 0x459   :  { %v3150_v57 = vpop.trf.xlu0  ;;  %5929 = vmatmul.mubr.msk.f32.vlgmr.msra.gmra.mxu0 %vm776_vm1, %v6585_v58  ;;  %5947 = vmatprep.subr.mxu1 %v6305_v0 }
 0x45a   :  { %5948 = vmatpush3.msra.mxu1 %v3182_v55  ;;  %5938 = vmatprep.subr.mxu0 %v6305_v0 }
 0x45b   :  { %5950 = vmatmul.mubr.msk.f32.vlgmr.msra.gmra.mxu1 %vm776_vm1, %v6567_v8  ;;  %v3246_v60 = vpop.trf.xlu1  ;;  %5959 = vmatprep.subr.mxu1 %v6305_v0 }
 0x45c   :  { %5942 = vmatprep.mubr.msk.f32.mxu0 %vm6306_vm0, %v6305_v0  ;;  %5963 = vmatprep.mubr.msk.f32.mxu1 %vm6306_vm0, %v6305_v0 }
 0x45d   :  { %v3151_v61 = vpop.trf.xlu0 }
 0x45e   :  { %5939 = vmatpush3.msra.mxu0 %v3151_v61 }
 0x45f   :  { %5940 = vmatprep.subr.mxu0 %v6305_v0  ;;  %v3247_v62 = vpop.trf.xlu1 }
 0x460   :  { %5941 = vmatpush3.msra.mxu0 %v3150_v57  ;;  %5960 = vmatpush3.msra.mxu1 %v3247_v62 }
 0x461   :  { %v3214_v63 = vpop.trf.xlu0  ;;  %5943 = vmatmul.mubr.msk.f32.vlgmr.msra.gmra.mxu0 %vm776_vm1, %v6587_v19  ;;  %5961 = vmatprep.subr.mxu1 %v6305_v0 }
 0x462   :  { %5962 = vmatpush3.msra.mxu1 %v3246_v60  ;;  %5952 = vmatprep.subr.mxu0 %v6305_v0 }
 0x463   :  { %5964 = vmatmul.mubr.msk.f32.vlgmr.msra.gmra.mxu1 %vm776_vm1, %v6570_v11  ;;  %5956 = vmatprep.mubr.msk.f32.mxu0 %vm6306_vm0, %v6305_v0  ;;  %v3950_v2 = vpop.trf.xlu1 }
 0x465   :  { %v3215_v1 = vpop.trf.xlu0 }
 0x466   :  { %5953 = vmatpush3.msra.mxu0 %v3215_v1 }
 0x467   :  { %5954 = vmatprep.subr.mxu0 %v6305_v0  ;;  %v6728_v50 = vpop.trf.xlu1 }
 0x468   :  { %5955 = vmatpush3.msra.mxu0 %v3214_v63 }
 0x469   :  { %5957 = vmatmul.mubr.msk.f32.vlgmr.msra.gmra.mxu0 %vm776_vm1, %v6589_v59 }
 0x46a   :  { %5968 = vmatprep.mubr.msk.f32.mxu0 %vm1361_vm2, %v3950_v2 }
 0x46c   :  { %v2986_v51 = vpop.permute.xlu1 %2985 }
 0x49a   :  { %v6683_v5 = vpop.f32.mrf.mxu0 }
 0x49c   :  { %v6687_v7 = vpop.f32.mrf.mxu0 }
 0x4d2   :  { %v6679_v3 = vpop.f32.mrf.mxu1 }
 0x4d4   :  { %v6681_v4 = vpop.f32.mrf.mxu1 }
 0x4d6   :  { %v6685_v6 = vpop.f32.mrf.mxu1 }
 0x4d8   :  { %v6691_v9 = vpop.f32.mrf.mxu1 }
 0x4e2   :  { %v6689_v8 = vpop.f32.mrf.mxu0 }
 0x4e4   :  { %v6695_v11 = vpop.f32.mrf.mxu0 }
 0x4e6   :  { %v6699_v54 = vpop.f32.mrf.mxu0 }
 0x4e8   :  { %v6705_v20 = vpop.f32.mrf.mxu0 }
 0x4fe   :  { %v6707_v39 = vpop.f32.mrf.mxu0 }
 0x500   :  { %v6693_v10 = vpop.f32.mrf.mxu1  ;;  %v6710_v59 = vpop.f32.mrf.mxu0 }
 0x502   :  { %v6697_v12 = vpop.f32.mrf.mxu1 }
 0x506   :  { %v6701_v17 = vpop.f32.mrf.mxu1 }
 0x508   :  { %v6703_v18 = vpop.f32.mrf.mxu1 }
 0x50b   :  { %v3402_v58 = vpop.f32.mrf.mxu1 }
 0x50c   :  { %v3839_v41 = vmul.f32 0.25, %v3402_v58 }
 0x50d   :  { %v5923_v43 = vpop.f32.mrf.mxu1 }
 0x50e   :  { %v3849_v19 = vsel %vm1361_vm2, %v3839_v41, -inf }
 0x50f   :  { %3850 = vmax.xlane.f32.xlu1 %v3849_v19 }
 0x511   :  { %v3330_v24 = vpop.f32.mrf.mxu0 }
 0x512   :  { %v3838_v25 = vmul.f32 0.25, %v3330_v24 }
 0x513   :  { %v5916_v14 = vpop.f32.mrf.mxu0  ;;  %v3546_v15 = vpop.f32.mrf.mxu1 }
 0x514   :  { %v3841_v26 = vmul.f32 0.25, %v3546_v15  ;;  %v3846_v27 = vsel %vm1361_vm2, %v3838_v25, -inf }
 0x515   :  { %3847 = vmax.xlane.f32.xlu0 %v3846_v27  ;;  %v5937_v28 = vpop.f32.mrf.mxu1 }
 0x516   :  { %v3855_v29 = vsel %vm1361_vm2, %v3841_v26, -inf }
 0x519   :  { %v3474_v30 = vpop.f32.mrf.mxu0  ;;  %3856 = vmax.xlane.f32.xlu0 %v3855_v29 }
 0x51a   :  { %v6714_v31 = vmul.f32 0.25, %v3474_v30 }
 0x51b   :  { %v5930_v32 = vpop.f32.mrf.mxu0  ;;  %v3690_v21 = vpop.f32.mrf.mxu1 }
 0x51c   :  { %v3843_v33 = vmul.f32 0.25, %v3690_v21  ;;  %v3852_v34 = vsel %vm1361_vm2, %v6714_v31, -inf }
 0x51d   :  { %3853 = vmax.xlane.f32.xlu1 %v3852_v34  ;;  %v5951_v22 = vpop.f32.mrf.mxu1 }
 0x51e   :  { %v3861_v23 = vsel %vm1361_vm2, %v3843_v33, -inf }
 0x51f   :  { %3862 = vmax.xlane.f32.xlu0 %v3861_v23 }
 0x521   :  { %v3618_v35 = vpop.f32.mrf.mxu0 }
 0x522   :  { %v6719_v16 = vmul.f32 0.25, %v3618_v35 }
 0x523   :  { %v5944_v36 = vpop.f32.mrf.mxu0  ;;  %v3834_v37 = vpop.f32.mrf.mxu1 }
 0x524   :  { %v3845_v38 = vmul.f32 0.25, %v3834_v37  ;;  %v3858_v42 = vsel %vm1361_vm2, %v6719_v16, -inf }
 0x525   :  { %3859 = vmax.xlane.f32.xlu1 %v3858_v42  ;;  %v5965_v44 = vpop.f32.mrf.mxu1 }
 0x526   :  { %v3867_v45 = vsel %vm1361_vm2, %v3845_v38, -inf }
 0x527   :  { %3868 = vmax.xlane.f32.xlu0 %v3867_v45 }
 0x529   :  { %v3762_v46 = vpop.f32.mrf.mxu0 }
 0x52a   :  { %v6724_v47 = vmul.f32 0.25, %v3762_v46 }
 0x52b   :  { %v5958_v48 = vpop.f32.mrf.mxu0 }
 0x52c   :  { %v3864_v49 = vsel %vm1361_vm2, %v6724_v47, -inf }
 0x52d   :  { %3865 = vmax.xlane.f32.xlu1 %v3864_v49 }
 0x554   :  { %3966 = vxpose.xlu0.b32.start.end [1/1] (short) (narrow) %v2986_v51, 16 }
 0x581   :  { %2988 = vrot.lane.b32.xlu0 %v6450_v40, %s6309_s10 }
 0x585   :  { %2997 = vrot.lane.b32.xlu0 %v6450_v40, %s6312_s12 }
 0x589   :  { %3003 = vrot.lane.b32.xlu0 %v6450_v40, %s6313_s13 }
 0x598   :  { %v3851_v52 = vpop.xlane.xlu1 %3850 }
 0x599   :  { %v3871_v53 = vsub.f32 %v3839_v41, %v3851_v52 }
 0x59b   :  { %v3880_v13 = vmul.f32 1.442695, %v3871_v53 }
 0x59e   :  { %v3848_v55 = vpop.xlane.xlu0 %3847 }
 0x59f   :  { %v3870_v56 = vsub.f32 %v3838_v25, %v3848_v55 }
 0x5a1   :  { %v3878_v57 = vmul.f32 1.442695, %v3870_v56 }
 0x5a2   :  { %v3857_v60 = vpop.xlane.xlu0 %3856 }
 0x5a3   :  { %6178 = vpow2.f32 %v3878_v57  ;;  %v3873_v61 = vsub.f32 %v3841_v26, %v3857_v60 }
 0x5a4   :  { %6180 = vpow2.f32 %v3880_v13 }
 0x5a5   :  { %v3884_v62 = vmul.f32 1.442695, %v3873_v61 }
 0x5a6   :  { %v3854_v34 = vpop.xlane.xlu1 %3853 }
 0x5a7   :  { %6182 = vpow2.f32 %v3884_v62  ;;  %v3872_v22 = vsub.f32 %v6714_v31, %v3854_v34 }
 0x5a8   :  { %v3863_v63 = vpop.xlane.xlu0 %3862 }
 0x5a9   :  { %v3875_v1 = vsub.f32 %v3843_v33, %v3863_v63  ;;  %v3882_v35 = vmul.f32 1.442695, %v3872_v22  ;;  %v2639_v22 = vlaneseq }
 0x5ab   :  { %v3888_v2 = vmul.f32 1.442695, %v3875_v1 }
 0x5ad   :  { %6184 = vpow2.f32 %v3888_v2 }
 0x5ae   :  { %v3860_v23 = vpop.xlane.xlu1 %3859 }
 0x5af   :  { %v3874_v36 = vsub.f32 %v6719_v16, %v3860_v23 }
 0x5b0   :  { %v6179_v58 = vpop.eup %6178  ;;  %v3869_v43 = vpop.xlane.xlu0 %3868 }
 0x5b1   :  { %v3877_v19 = vsub.f32 %v3845_v38, %v3869_v43  ;;  %v3894_v24 = vsel %vm1361_vm2, %v6179_v58, 0.0  ;;  %v6181_v41 = vpop.eup %6180  ;;  %v3886_v38 = vmul.f32 1.442695, %v3874_v36 }
 0x5b2   :  { %3895 = vadd.xlane.f32.xlu0 %v3894_v24  ;;  %v3897_v14 = vsel %vm1361_vm2, %v6181_v41, 0.0 }
 0x5b3   :  { %v3892_v25 = vmul.f32 1.442695, %v3877_v19 }
 0x5b4   :  { %v6183_v15 = vpop.eup %6182 }
 0x5b5   :  { %6186 = vpow2.f32 %v3892_v25  ;;  %v3903_v26 = vsel %vm1361_vm2, %v6183_v15, 0.0 }
 0x5b6   :  { %3898 = vadd.xlane.f32.xlu0 %v3897_v14  ;;  %v3866_v37 = vpop.xlane.xlu1 %3865  ;;  %6188 = vpow2.f32 %v3882_v35 }
 0x5b7   :  { %v3876_v42 = vsub.f32 %v6724_v47, %v3866_v37  ;;  %6190 = vpow2.f32 %v3886_v38  ;;  %v2640_v37 = vshrl.u32 %v2639_v22, 7 }
 0x5b9   :  { %v3890_v45 = vmul.f32 1.442695, %v3876_v42 }
 0x5ba   :  { %v6185_v27 = vpop.eup %6184  ;;  %3904 = vadd.xlane.f32.xlu0 %v3903_v26 }
 0x5bb   :  { %v3909_v28 = vsel %vm1361_vm2, %v6185_v27, 0.0  ;;  %6192 = vpow2.f32 %v3890_v45 }
 0x5be   :  { %3910 = vadd.xlane.f32.xlu0 %v3909_v28 }
 0x5c2   :  { %v6740_v29 = vpop.eup %6186 }
 0x5c3   :  { %v3915_v30 = vsel %vm1361_vm2, %v6740_v29, 0.0 }
 0x5c4   :  { %3916 = vadd.xlane.f32.xlu0 %v3915_v30 }
 0x5d0   :  { %v3982_v32 = vpop.trf.xlu0 }
 0x5d1   :  { %5973 = vmatprep.mubr.msk.f32.mxu1 %vm1361_vm2, %v3982_v32 }
 0x5d4   :  { %v3983_v21 = vpop.trf.xlu0 }
 0x5f3   :  { %v2989_v33 = vpop.permute.xlu0 %2988 }
 0x5f4   :  { %3998 = vxpose.xlu1.b32.start.end [1/1] (short) (narrow) %v2989_v33, 16  ;;  %v6314_v33 = vmov 1983009808  }
 0x5f5   :  { %v2637_v34 = vunpack.c.l.s4 %v6314_v33 }
 0x5f7   :  { %v2998_v44 = vpop.permute.xlu0 %2997  ;;  %v2638_v36 = vunpack.c.0.s8 %v2637_v34 }
 0x5f9   :  { %v6820_v38 = vsub.s32 %v2638_v36, %v2640_v37 }
 0x5fb   :  { %v3004_v46 = vpop.permute.xlu0 %3003 }
 0x616   :  { %2991 = vrot.lane.b32.xlu1 %v6450_v40, %s6308_s9 }
 0x61a   :  { %2994 = vrot.lane.b32.xlu1 %v6450_v40, %s6303_s5 }
 0x61e   :  { %3000 = vrot.lane.b32.xlu1 %v6450_v40, %s6311_s11  ;;  %v6754_v40 = vpop.eup %6188 }
 0x61f   :  { %v3900_v31 = vsel %vm1361_vm2, %v6754_v40, 0.0  ;;  %v6758_v16 = vpop.eup %6190 }
 0x620   :  { %v3906_v47 = vsel %vm1361_vm2, %v6758_v16, 0.0  ;;  %v6762_v52 = vpop.eup %6192 }
 0x621   :  { %v3912_v56 = vsel %vm1361_vm2, %v6762_v52, 0.0 }
 0x63b   :  { %v3896_v48 = vpop.xlane.xlu0 %3895 }
 0x63c   :  { %6194 = vrcp.f32 %v3896_v48 }
 0x63f   :  { %v3899_v49 = vpop.xlane.xlu0 %3898 }
 0x640   :  { %6196 = vrcp.f32 %v3899_v49 }
 0x642   :  { %3901 = vadd.xlane.f32.xlu1 %v3900_v31 }
 0x643   :  { %v3905_v51 = vpop.xlane.xlu0 %3904 }
 0x644   :  { %6198 = vrcp.f32 %v3905_v51 }
 0x646   :  { %3907 = vadd.xlane.f32.xlu1 %v3906_v47 }
 0x647   :  { %v3911_v53 = vpop.xlane.xlu0 %3910 }
 0x648   :  { %6200 = vrcp.f32 %v3911_v53 }
 0x649   :  { %v6195_v55 = vpop.eup %6194 }
 0x64a   :  { %3913 = vadd.xlane.f32.xlu1 %v3912_v56  ;;  %v3926_v13 = vmul.f32 %v6195_v55, %v6179_v58 }
 0x64c   :  { %5966 = vmatprep.subr.msk.mxu0 %vm1361_vm2, %v3926_v13 }
 0x64d   :  { %v6197_v57 = vpop.eup %6196  ;;  %5967 = vmatpush3.xpose.msk.msra.mxu0 %vm1361_vm2, %v3926_v13 }
 0x64e   :  { %v3927_v60 = vmul.f32 %v6197_v57, %v6181_v41 }
 0x650   :  { %5969 = vmatmul.mubr.msk.f32.vlgmr.msra.gmra.mxu0 %vm1361_vm2, %v6728_v50  ;;  %5971 = vmatprep.subr.msk.mxu1 %vm1361_vm2, %v3927_v60 }
 0x651   :  { %v6199_v61 = vpop.eup %6198  ;;  %5972 = vmatpush3.xpose.msk.msra.mxu1 %vm1361_vm2, %v3927_v60 }
 0x652   :  { %v3929_v62 = vmul.f32 %v6199_v61, %v6183_v15 }
 0x654   :  { %5974 = vmatmul.mubr.msk.f32.vlgmr.msra.gmra.mxu1 %vm1361_vm2, %v3983_v21  ;;  %5981 = vmatprep.subr.msk.mxu1 %vm1361_vm2, %v3929_v62 }
 0x655   :  { %v6201_v63 = vpop.eup %6200  ;;  %5982 = vmatpush3.xpose.msk.msra.mxu1 %vm1361_vm2, %v3929_v62 }
 0x656   :  { %v3931_v1 = vmul.f32 %v6201_v63, %v6185_v27 }
 0x658   :  { %5991 = vmatprep.subr.msk.mxu1 %vm1361_vm2, %v3931_v1 }
 0x670   :  { %v4014_v2 = vpop.trf.xlu1 }
 0x671   :  { %5978 = vmatprep.mubr.msk.f32.mxu0 %vm1361_vm2, %v4014_v2 }
 0x674   :  { %v4015_v50 = vpop.trf.xlu1 }
 0x688   :  { %v2992_v58 = vpop.permute.xlu1 %2991 }
 0x689   :  { %4030 = vxpose.xlu0.b32.start.end [1/1] (short) (narrow) %v2992_v58, 16 }
 0x68c   :  { %v2995_v43 = vpop.permute.xlu1 %2994 }
 0x68d   :  { %4062 = vxpose.xlu1.b32.start.end [1/1] (short) (narrow) %v2995_v43, 16 }
 0x68e   :  { %4094 = vxpose.xlu0.b32.start.end [1/1] (short) (narrow) %v2998_v44, 16  ;;  %v6315_v44 = vmov 1934713408  }
 0x68f   :  { %v2701_v45 = vunpack.c.l.s4 %v6315_v44 }
 0x690   :  { %v3001_v19 = vpop.permute.xlu1 %3000 }
 0x692   :  { %4126 = vxpose.xlu1.b32.start.end [1/1] (short) (narrow) %v3001_v19, 16 }
 0x693   :  { %4158 = vxpose.xlu0.b32.start.end [1/1] (short) (narrow) %v3004_v46, 16 }
 0x697   :  { %2378 = vxpose.xlu1.b32.start [1/2] (short) (narrow) %v6687_v7, 8 }
 0x698   :  { %2410 = vxpose.xlu0.b32.start [1/2] (short) (narrow) %v6681_v4, 8 }
 0x69b   :  { %2379 = vxpose.xlu1.b32.end [2/2] (short) (narrow) %v6683_v5, 8 }
 0x69c   :  { %2411 = vxpose.xlu0.b32.end [2/2] (short) (narrow) %v6679_v3, 8 }
 0x69f   :  { %2442 = vxpose.xlu1.b32.start [1/2] (short) (narrow) %v6695_v11, 8 }
 0x6a0   :  { %2474 = vxpose.xlu0.b32.start [1/2] (short) (narrow) %v6691_v9, 8 }
 0x6a3   :  { %2443 = vxpose.xlu1.b32.end [2/2] (short) (narrow) %v6689_v8, 8 }
 0x6a4   :  { %2475 = vxpose.xlu0.b32.end [2/2] (short) (narrow) %v6685_v6, 8 }
 0x6a7   :  { %2506 = vxpose.xlu1.b32.start [1/2] (short) (narrow) %v6705_v20, 8 }
 0x6a8   :  { %2538 = vxpose.xlu0.b32.start [1/2] (short) (narrow) %v6697_v12, 8  ;;  %v3917_v12 = vpop.xlane.xlu0 %3916 }
 0x6ab   :  { %2507 = vxpose.xlu1.b32.end [2/2] (short) (narrow) %v6699_v54, 8 }
 0x6ac   :  { %2539 = vxpose.xlu0.b32.end [2/2] (short) (narrow) %v6693_v10, 8 }
 0x6af   :  { %2570 = vxpose.xlu1.b32.start [1/2] (short) (narrow) %v6710_v59, 8 }
 0x6b0   :  { %2602 = vxpose.xlu0.b32.start [1/2] (short) (narrow) %v6703_v18, 8 }
 0x6b3   :  { %2571 = vxpose.xlu1.b32.end [2/2] (short) (narrow) %v6707_v39, 8 }
 0x6b4   :  { %2603 = vxpose.xlu0.b32.end [2/2] (short) (narrow) %v6701_v17, 8 }
 0x6cb   :  { %v3902_v3 = vpop.xlane.xlu1 %3901 }
 0x6cc   :  { %6202 = vrcp.f32 %v3902_v3 }
 0x6cf   :  { %v3908_v4 = vpop.xlane.xlu1 %3907 }
 0x6d0   :  { %6204 = vrcp.f32 %v3908_v4 }
 0x6d3   :  { %v3914_v5 = vpop.xlane.xlu1 %3913 }
 0x6d4   :  { %6206 = vrcp.f32 %v3914_v5 }
 0x6d5   :  { %6208 = vrcp.f32 %v3917_v12 }
 0x6d9   :  { %v6203_v6 = vpop.eup %6202 }
 0x6da   :  { %v3928_v7 = vmul.f32 %v6203_v6, %v6754_v40 }
 0x6dc   :  { %5976 = vmatprep.subr.msk.mxu0 %vm1361_vm2, %v3928_v7 }
 0x6dd   :  { %v6205_v8 = vpop.eup %6204  ;;  %5977 = vmatpush3.xpose.msk.msra.mxu0 %vm1361_vm2, %v3928_v7 }
 0x6de   :  { %v3930_v9 = vmul.f32 %v6205_v8, %v6758_v16  ;;  %v2702_v16 = vunpack.c.0.s8 %v2701_v45 }
 0x6e0   :  { %5979 = vmatmul.mubr.msk.f32.vlgmr.msra.gmra.mxu0 %vm1361_vm2, %v4015_v50  ;;  %5986 = vmatprep.subr.msk.mxu0 %vm1361_vm2, %v3930_v9  ;;  %v6826_v55 = vsub.s32 %v2702_v16, %v2640_v37 }
 0x6e1   :  { %v6207_v10 = vpop.eup %6206  ;;  %5987 = vmatpush3.xpose.msk.msra.mxu0 %vm1361_vm2, %v3930_v9 }
 0x6e2   :  { %v3932_v11 = vmul.f32 %v6207_v10, %v6762_v52  ;;  %v6209_v17 = vpop.eup %6208 }
 0x6e3   :  { %v3933_v39 = vmul.f32 %v6209_v17, %v6740_v29 }
 0x6e4   :  { %5996 = vmatprep.subr.msk.mxu0 %vm1361_vm2, %v3932_v11 }
 0x705   :  { %v4046_v54 = vpop.trf.xlu0 }
 0x706   :  { %5983 = vmatprep.mubr.msk.f32.mxu1 %vm1361_vm2, %v4046_v54 }
 0x709   :  { %v4047_v18 = vpop.trf.xlu0  ;;  %v4078_v20 = vpop.trf.xlu1 }
 0x70a   :  { %5984 = vmatmul.mubr.msk.f32.vlgmr.msra.gmra.mxu1 %vm1361_vm2, %v4047_v18  ;;  %5988 = vmatprep.mubr.msk.f32.mxu0 %vm1361_vm2, %v4078_v20 }
 0x70b   :  { %5992 = vmatpush3.xpose.msk.msra.mxu1 %vm1361_vm2, %v3931_v1 }
 0x70c   :  { %6001 = vmatprep.subr.msk.mxu1 %vm1361_vm2, %v3933_v39 }
 0x70d   :  { %v4110_v59 = vpop.trf.xlu0  ;;  %v4079_v24 = vpop.trf.xlu1 }
 0x70e   :  { %5989 = vmatmul.mubr.msk.f32.vlgmr.msra.gmra.mxu0 %vm1361_vm2, %v4079_v24  ;;  %5993 = vmatprep.mubr.msk.f32.mxu1 %vm1361_vm2, %v4110_v59 }
 0x70f   :  { %5997 = vmatpush3.xpose.msk.msra.mxu0 %vm1361_vm2, %v3932_v11 }
 0x710   :  { %v5970_v41 = vpop.f32.mrf.mxu0  ;;  %6006 = vmatprep.subr.bf16.mxu0 %v6305_v0 }
 0x711   :  { %v4111_v25 = vpop.trf.xlu0  ;;  %v4142_v14 = vpop.trf.xlu1 }
 0x712   :  { %v4265_v15 = vpop.f32.mrf.mxu0  ;;  %5994 = vmatmul.mubr.msk.f32.vlgmr.msra.gmra.mxu1 %vm1361_vm2, %v4111_v25  ;;  %5998 = vmatprep.mubr.msk.f32.mxu0 %vm1361_vm2, %v4142_v14  ;;  %v6138_v25 = vld [vmem:[#allocation7 + $0x38] sm:$0xff]  }
 0x713   :  { %6002 = vmatpush3.xpose.msk.msra.mxu1 %vm1361_vm2, %v3933_v39  ;;  %4862 = vxpose.xlu1.b32.start [1/2] (short) (narrow) %v4265_v15, 8 }
 0x714   :  { %v5975_v26 = vpop.f32.mrf.mxu1 }
 0x715   :  { %v4174_v27 = vpop.trf.xlu0  ;;  %v4143_v28 = vpop.trf.xlu1 }
 0x716   :  { %v4349_v29 = vpop.f32.mrf.mxu1  ;;  %5999 = vmatmul.mubr.msk.f32.vlgmr.msra.gmra.mxu0 %vm1361_vm2, %v4143_v28  ;;  %6003 = vmatprep.mubr.msk.f32.mxu1 %vm1361_vm2, %v4174_v27 }
 0x717   :  { %4894 = vxpose.xlu0.b32.start [1/2] (short) (narrow) %v4349_v29, 8  ;;  %4863 = vxpose.xlu1.b32.end [2/2] (short) (narrow) %v5970_v41, 8 }
 0x718   :  { %6022 = vmatprep.mubr.msk.bf16.mxu0 %vm6306_vm0, %v6305_v0  ;;  %6007 = vmatpush3.bf16.msra.mxu0 %v6138_v25 }
 0x719   :  { %v4175_v30 = vpop.trf.xlu0  ;;  %v2394_v35 = vpop.trf.xlu1  ;;  %6008 = vmatprep.subr.bf16.mxu0 %v6305_v0 }
 0x71a   :  { %6004 = vmatmul.mubr.msk.f32.vlgmr.msra.gmra.mxu1 %vm1361_vm2, %v4175_v30 }
 0x71b   :  { %4895 = vxpose.xlu0.b32.end [2/2] (short) (narrow) %v5975_v26, 8 }
 0x71d   :  { %v2426_v23 = vpop.trf.xlu0  ;;  %v2458_v46 = vpop.trf.xlu1 }
 0x71e   :  { %v2634_v49 = vcombine.low %v2394_v35, %v2458_v46  ;;  %v2635_v31 = vcombine.high %v2394_v35, %v2458_v46 }
 0x720   :  { %v2642_v52 = vrot.slane %v2634_v49, %v6820_v38  ;;  %v2649_v53 = vrot.slane %v2635_v31, %v6820_v38 }
 0x721   :  { %v2490_v42 = vpop.trf.xlu0 }
 0x722   :  { %v2650_v48 = vcombine.low %v2426_v23, %v2490_v42  ;;  %v2651_v40 = vcombine.high %v2426_v23, %v2490_v42 }
 0x723   :  { %v2522_v14 = vpop.trf.xlu1 }
 0x724   :  { %v2658_v51 = vrot.slane %v2650_v48, %v6820_v38  ;;  %v2665_v47 = vrot.slane %v2651_v40, %v6820_v38 }
 0x725   :  { %v2554_v15 = vpop.trf.xlu0 }
 0x726   :  { %v2698_v56 = vcombine.low %v2642_v52, %v2658_v51  ;;  %v2699_v13 = vcombine.high %v2642_v52, %v2658_v51  ;;  %v2714_v57 = vcombine.low %v2649_v53, %v2665_v47  ;;  %v2715_v60 = vcombine.high %v2649_v53, %v2665_v47 }
 0x728   :  { %v2706_v61 = vrot.slane %v2698_v56, %v6826_v55  ;;  %v2713_v62 = vrot.slane %v2699_v13, %v6826_v55  ;;  %v2722_v63 = vrot.slane %v2714_v57, %v6826_v55  ;;  %v2729_v1 = vrot.slane %v2715_v60, %v6826_v55 }
 0x72a   :  { %v5624_v2 = vcombine.low %v2706_v61, %v2713_v62  ;;  %v5626_v50 = vcombine.high %v2706_v61, %v2713_v62  ;;  %v5628_v58 = vcombine.low %v2722_v63, %v2729_v1  ;;  %v5630_v43 = vcombine.high %v2722_v63, %v2729_v1 }
 0x72b   :  { %v2586_v26 = vpop.trf.xlu1 }
 0x72c   :  { %v6833_v19 = vrot.slane %v5624_v2, %v6820_v38  ;;  %v6836_v3 = vrot.slane %v5626_v50, %v6820_v38  ;;  %v6839_v4 = vrot.slane %v5628_v58, %v6820_v38  ;;  %v6842_v5 = vrot.slane %v5630_v43, %v6820_v38  ;;  %v2618_v27 = vpop.trf.xlu0 }
 0x72d   :  { %v2683_v22 = vcombine.high %v2554_v15, %v2618_v27  ;;  %v2667_v23 = vcombine.high %v2522_v14, %v2586_v26 }
 0x72e   :  { %v2834_v7 = vcombine.low %v6833_v19, %v6836_v3  ;;  %v2866_v8 = vcombine.low %v6839_v4, %v6842_v5  ;;  %v2835_v58 = vcombine.high %v6833_v19, %v6836_v3  ;;  %v2867_v43 = vcombine.high %v6839_v4, %v6842_v5 }
 0x72f   :  { %v2697_v48 = vrot.slane %v2683_v22, %v6820_v38  ;;  %v2681_v40 = vrot.slane %v2667_v23, %v6820_v38  ;;  %v6141_v22 = vld [vmem:[#allocation7 + $0x20] sm:$0xff]  }
 0x730   :  { %v6849_v10 = vrot.slane %v2834_v7, %v6826_v55  ;;  %v6852_v11 = vrot.slane %v2866_v8, %v6826_v55  ;;  %v2881_v25 = vrot.slane %v2867_v43, %v6826_v55 }
 0x731   :  { %v2746_v13 = vcombine.low %v2681_v40, %v2697_v48  ;;  %v2747_v57 = vcombine.high %v2681_v40, %v2697_v48 }
 0x732   :  { %v2898_v54 = vcombine.low %v6849_v10, %v6852_v11 }
 0x78f   :  { %v4878_v28 = vpop.trf.xlu1 }
 0x793   :  { %v4910_v29 = vpop.trf.xlu0 }
 0x7a0   :  { %v5980_v32 = vpop.f32.mrf.mxu0 }
 0x7a2   :  { %v4433_v21 = vpop.f32.mrf.mxu0 }
 0x7a3   :  { %4926 = vxpose.xlu1.b32.start [1/2] (short) (narrow) %v4433_v21, 8  ;;  %v2666_v21 = vcombine.low %v2522_v14, %v2586_v26  ;;  %v6140_v26 = vld [vmem:[#allocation7 + $0x28] sm:$0xff]  }
 0x7a5   :  { %v2674_v36 = vrot.slane %v2666_v21, %v6820_v38 }
 0x7a7   :  { %4927 = vxpose.xlu1.b32.end [2/2] (short) (narrow) %v5980_v32, 8  ;;  %v2682_v32 = vcombine.low %v2554_v15, %v2618_v27 }
 0x7a9   :  { %v2690_v35 = vrot.slane %v2682_v32, %v6820_v38 }
 0x7ab   :  { %v2730_v16 = vcombine.low %v2674_v36, %v2690_v35  ;;  %v2731_v51 = vcombine.high %v2674_v36, %v2690_v35 }
 0x7ad   :  { %v2738_v2 = vrot.slane %v2730_v16, %v6826_v55  ;;  %v2745_v50 = vrot.slane %v2731_v51, %v6826_v55 }
 0x7af   :  { %v5625_v3 = vcombine.low %v2738_v2, %v2745_v50  ;;  %v5627_v4 = vcombine.high %v2738_v2, %v2745_v50 }
 0x7b1   :  { %v2785_v23 = vrot.slane %v5625_v3, %v6820_v38  ;;  %v2801_v35 = vrot.slane %v5627_v4, %v6820_v38 }
 0x7ca   :  { %v5985_v6 = vpop.f32.mrf.mxu1 }
 0x7cc   :  { %v4517_v9 = vpop.f32.mrf.mxu1 }
 0x7cd   :  { %4958 = vxpose.xlu0.b32.start [1/2] (short) (narrow) %v4517_v9, 8 }
 0x7ce   :  { %v5990_v12 = vpop.f32.mrf.mxu0 }
 0x7d0   :  { %v4601_v17 = vpop.f32.mrf.mxu0 }
 0x7d1   :  { %4959 = vxpose.xlu0.b32.end [2/2] (short) (narrow) %v5985_v6, 8  ;;  %4990 = vxpose.xlu1.b32.start [1/2] (short) (narrow) %v4601_v17, 8  ;;  %v2754_v17 = vrot.slane %v2746_v13, %v6826_v55 }
 0x7d2   :  { %v5995_v18 = vpop.f32.mrf.mxu1 }
 0x7d4   :  { %v4685_v20 = vpop.f32.mrf.mxu1 }
 0x7d5   :  { %5022 = vxpose.xlu0.b32.start [1/2] (short) (narrow) %v4685_v20, 8  ;;  %4991 = vxpose.xlu1.b32.end [2/2] (short) (narrow) %v5990_v12, 8  ;;  %v6139_v12 = vld [vmem:[#allocation7 + $0x30] sm:$0xff]  }
 0x7d6   :  { %v6000_v39 = vpop.f32.mrf.mxu0  ;;  %6009 = vmatpush3.bf16.msra.mxu0 %v6139_v12 }
 0x7d7   :  { %6010 = vmatprep.subr.bf16.mxu0 %v6305_v0 }
 0x7d8   :  { %v4769_v59 = vpop.f32.mrf.mxu0 }
 0x7d9   :  { %5023 = vxpose.xlu0.b32.end [2/2] (short) (narrow) %v5995_v18, 8  ;;  %5054 = vxpose.xlu1.b32.start [1/2] (short) (narrow) %v4769_v59, 8  ;;  %v2761_v18 = vrot.slane %v2747_v57, %v6826_v55 }
 0x7da   :  { %v6005_v24 = vpop.f32.mrf.mxu1  ;;  %6011 = vmatpush3.bf16.msra.mxu0 %v6140_v26 }
 0x7db   :  { %v5629_v27 = vcombine.low %v2754_v17, %v2761_v18  ;;  %v5631_v32 = vcombine.high %v2754_v17, %v2761_v18  ;;  %6012 = vmatprep.subr.bf16.mxu0 %v6305_v0  ;;  %v2850_v17 = vcombine.low %v2785_v23, %v2801_v35 }
 0x7dc   :  { %v4853_v41 = vpop.f32.mrf.mxu1 }
 0x7dd   :  { %5086 = vxpose.xlu0.b32.start [1/2] (short) (narrow) %v4853_v41, 8  ;;  %5055 = vxpose.xlu1.b32.end [2/2] (short) (narrow) %v6000_v39, 8  ;;  %v2849_v41 = vrot.slane %v2835_v58, %v6826_v55  ;;  %v2817_v13 = vrot.slane %v5629_v27, %v6820_v38  ;;  %v2833_v57 = vrot.slane %v5631_v32, %v6820_v38  ;;  %v6144_v32 = vld [vmem:[#allocation7 + $0x8] sm:$0xff]  }
 0x7de   :  { %6013 = vmatpush3.bf16.msra.mxu0 %v6141_v22  ;;  %v2851_v58 = vcombine.high %v2785_v23, %v2801_v35 }
 0x7df   :  { %6014 = vmatprep.subr.bf16.mxu0 %v6305_v0  ;;  %v2901_v50 = vcombine.high %v2849_v41, %v2881_v25  ;;  %v2883_v12 = vcombine.high %v2817_v13, %v2833_v57  ;;  %v2882_v18 = vcombine.low %v2817_v13, %v2833_v57 }
 0x7e1   :  { %5087 = vxpose.xlu0.b32.end [2/2] (short) (narrow) %v6005_v24, 8  ;;  %v2890_v26 = vrot.slane %v2882_v18, %v6826_v55 }
 0x81f   :  { %v4942_v30 = vpop.trf.xlu1 }
 0x820   :  { %v5118_v33 = vcombine.low %v4878_v28, %v4942_v30  ;;  %v5119_v34 = vcombine.high %v4878_v28, %v4942_v30 }
 0x822   :  { %v5126_v45 = vrot.slane %v5118_v33, %v6820_v38  ;;  %v5133_v46 = vrot.slane %v5119_v34, %v6820_v38 }
 0x849   :  { %v4974_v37 = vpop.trf.xlu0 }
 0x84a   :  { %v5134_v42 = vcombine.low %v4910_v29, %v4974_v37  ;;  %v5135_v44 = vcombine.high %v4910_v29, %v4974_v37 }
 0x84c   :  { %v5142_v49 = vrot.slane %v5134_v42, %v6820_v38  ;;  %v5149_v31 = vrot.slane %v5135_v44, %v6820_v38 }
 0x84d   :  { %v5006_v60 = vpop.trf.xlu1 }
 0x84e   :  { %v5182_v47 = vcombine.low %v5126_v45, %v5142_v49  ;;  %v5183_v52 = vcombine.high %v5126_v45, %v5142_v49  ;;  %v5198_v53 = vcombine.low %v5133_v46, %v5149_v31  ;;  %v5199_v56 = vcombine.high %v5133_v46, %v5149_v31 }
 0x84f   :  { %v2900_v46 = vcombine.low %v2849_v41, %v2881_v25  ;;  %v2899_v49 = vcombine.high %v6849_v10, %v6852_v11  ;;  %v2865_v25 = vrot.slane %v2851_v58, %v6826_v55 }
 0x850   :  { %v5190_v61 = vrot.slane %v5182_v47, %v6826_v55  ;;  %v5197_v62 = vrot.slane %v5183_v52, %v6826_v55  ;;  %v5206_v63 = vrot.slane %v5198_v53, %v6826_v55  ;;  %v5213_v1 = vrot.slane %v5199_v56, %v6826_v55  ;;  %v6142_v56 = vld [vmem:[#allocation7 + $0x18] sm:$0xff]  }
 0x851   :  { %v5038_v20 = vpop.trf.xlu0  ;;  %6015 = vmatpush3.bf16.msra.mxu0 %v6142_v56 }
 0x852   :  { %v5664_v6 = vcombine.low %v5190_v61, %v5197_v62  ;;  %v5666_v7 = vcombine.high %v5190_v61, %v5197_v62  ;;  %v5668_v8 = vcombine.low %v5206_v63, %v5213_v1  ;;  %v5670_v9 = vcombine.high %v5206_v63, %v5213_v1  ;;  %6016 = vmatprep.subr.bf16.mxu0 %v6305_v0 }
 0x854   :  { %v5262_v39 = vrot.slane %v5664_v6, %v6820_v38  ;;  %v5278_v59 = vrot.slane %v5666_v7, %v6820_v38  ;;  %v5294_v24 = vrot.slane %v5668_v8, %v6820_v38  ;;  %v5310_v19 = vrot.slane %v5670_v9, %v6820_v38 }
 0x855   :  { %v5070_v5 = vpop.trf.xlu1 }
 0x856   :  { %v5319_v14 = vcombine.high %v5262_v39, %v5278_v59  ;;  %v5351_v15 = vcombine.high %v5294_v24, %v5310_v19  ;;  %v5150_v28 = vcombine.low %v5006_v60, %v5070_v5  ;;  %v5318_v29 = vcombine.low %v5262_v39, %v5278_v59 }
 0x857   :  { %v5350_v30 = vcombine.low %v5294_v24, %v5310_v19  ;;  %v5151_v21 = vcombine.high %v5006_v60, %v5070_v5  ;;  %v6143_v19 = vld [vmem:[#allocation7 + $0x10] sm:$0xff]  }
 0x858   :  { %v5333_v33 = vrot.slane %v5319_v14, %v6826_v55  ;;  %v5365_v34 = vrot.slane %v5351_v15, %v6826_v55  ;;  %v6889_v37 = vrot.slane %v5318_v29, %v6826_v55  ;;  %v5158_v40 = vrot.slane %v5150_v28, %v6820_v38  ;;  %6017 = vmatpush3.bf16.msra.mxu0 %v6143_v19 }
 0x859   :  { %v5102_v36 = vpop.trf.xlu0  ;;  %v6892_v42 = vrot.slane %v5350_v30, %v6826_v55  ;;  %v5165_v51 = vrot.slane %v5151_v21, %v6820_v38  ;;  %v2897_v14 = vrot.slane %v2883_v12, %v6826_v55  ;;  %v2858_v15 = vrot.slane %v2850_v17, %v6826_v55  ;;  %6018 = vmatprep.subr.bf16.mxu0 %v6305_v0 }
 0x85a   :  { %v5166_v44 = vcombine.low %v5038_v20, %v5102_v36  ;;  %v5167_v45 = vcombine.high %v5038_v20, %v5102_v36  ;;  %v5384_v48 = vcombine.low %v5333_v33, %v5365_v34  ;;  %v5385_v61 = vcombine.high %v5333_v33, %v5365_v34 }
 0x85b   :  { %v5383_v31 = vcombine.high %v6889_v37, %v6892_v42  ;;  %v5382_v16 = vcombine.low %v6889_v37, %v6892_v42  ;;  %v2904_v22 = vcombine.low %v2865_v25, %v2897_v14  ;;  %v2902_v35 = vcombine.low %v2858_v15, %v2890_v26 }
 0x85c   :  { %v5174_v47 = vrot.slane %v5166_v44, %v6820_v38  ;;  %v5181_v52 = vrot.slane %v5167_v45, %v6820_v38  ;;  %v6052_v53 = vpack.i.bf16 %v5384_v48, %v2900_v46  ;;  %v6057_v9 = vpack.i.bf16 %v5385_v61, %v2901_v50  ;;  %6019 = vmatpush3.bf16.msra.mxu0 %v6144_v32  ;;  %v6145_v44 = vld [vmem:[#allocation7] sm:$0xff]  }
 0x85d   :  { %v6047_v60 = vpack.i.bf16 %v5383_v31, %v2899_v49  ;;  %6020 = vmatprep.subr.bf16.mxu0 %v6305_v0 }
 0x85e   :  { %v5214_v62 = vcombine.low %v5158_v40, %v5174_v47  ;;  %v5215_v63 = vcombine.high %v5158_v40, %v5174_v47  ;;  %v5230_v1 = vcombine.low %v5165_v51, %v5181_v52  ;;  %v5231_v2 = vcombine.high %v5165_v51, %v5181_v52  ;;  %6053 = vrot.lane.b32.xlu0 %v6052_v53, %s6311_s11 }
 0x85f   :  { %6048 = vrot.lane.b32.xlu1 %v6047_v60, %s6313_s13  ;;  %v2903_v40 = vcombine.high %v2858_v15, %v2890_v26 }
 0x860   :  { %v5222_v43 = vrot.slane %v5214_v62, %v6826_v55  ;;  %v5229_v6 = vrot.slane %v5215_v63, %v6826_v55  ;;  %v5238_v7 = vrot.slane %v5230_v1, %v6826_v55  ;;  %v5245_v8 = vrot.slane %v5231_v2, %v6826_v55  ;;  %6021 = vmatpush3.bf16.msra.mxu0 %v6145_v44 }
 0x862   :  { %v5665_v20 = vcombine.low %v5222_v43, %v5229_v6  ;;  %v5667_v39 = vcombine.high %v5222_v43, %v5229_v6  ;;  %v5669_v59 = vcombine.low %v5238_v7, %v5245_v8  ;;  %v5671_v24 = vcombine.high %v5238_v7, %v5245_v8 }
 0x863   :  { %6058 = vrot.lane.b32.xlu1 %v6057_v9, %s6312_s12 }
 0x864   :  { %v5269_v3 = vrot.slane %v5665_v20, %v6820_v38  ;;  %v5285_v4 = vrot.slane %v5667_v39, %v6820_v38  ;;  %v5301_v5 = vrot.slane %v5669_v59, %v6820_v38  ;;  %v5317_v41 = vrot.slane %v5671_v24, %v6820_v38 }
 0x866   :  { %v5335_v27 = vcombine.high %v5269_v3, %v5285_v4  ;;  %v5367_v28 = vcombine.high %v5301_v5, %v5317_v41  ;;  %v5334_v29 = vcombine.low %v5269_v3, %v5285_v4  ;;  %v5366_v30 = vcombine.low %v5301_v5, %v5317_v41 }
 0x868   :  { %v5349_v21 = vrot.slane %v5335_v27, %v6826_v55  ;;  %v5381_v38 = vrot.slane %v5367_v28, %v6826_v55  ;;  %v5342_v33 = vrot.slane %v5334_v29, %v6826_v55  ;;  %v5374_v34 = vrot.slane %v5366_v30, %v6826_v55 }
 0x869   :  { %v2905_v55 = vcombine.high %v2865_v25, %v2897_v14 }
 0x86a   :  { %v5388_v23 = vcombine.low %v5349_v21, %v5381_v38  ;;  %v5386_v36 = vcombine.low %v5342_v33, %v5374_v34  ;;  %v5387_v48 = vcombine.high %v5342_v33, %v5374_v34  ;;  %v5389_v31 = vcombine.high %v5349_v21, %v5381_v38 }
 0x86c   :  { %v6072_v45 = vpack.i.bf16 %v5388_v23, %v2904_v22  ;;  %v6062_v46 = vpack.i.bf16 %v5386_v36, %v2902_v35  ;;  %v6067_v49 = vpack.i.bf16 %v5387_v48, %v2903_v40  ;;  %v6077_v0 = vpack.i.bf16 %v5389_v31, %v2905_v55 }
 0x86e   :  { %6073 = vrot.lane.b32.xlu0 %v6072_v45, %s6309_s10  ;;  %6063 = vrot.lane.b32.xlu1 %v6062_v46, %s6303_s5 }
 0x872   :  { %6068 = vrot.lane.b32.xlu1 %v6067_v49, %s6308_s9 }
 0x876   :  { %6078 = vrot.lane.b32.xlu1 %v6077_v0, %s6310_s3 }
 0x8d0   :  { %v6054_v52 = vpop.permute.xlu0 %6053 }
 0x8d1   :  { %v6049_v51 = vpop.permute.xlu1 %6048  ;;  %v6056_v13 = vunpack.i.h.bf16 %v6054_v52  ;;  %v6055_v57 = vunpack.i.l.bf16 %v6054_v52 }
 0x8d2   :  { %v6051_v53 = vunpack.i.h.bf16 %v6049_v51  ;;  %v6050_v56 = vunpack.i.l.bf16 %v6049_v51 }
 0x8d4   :  { %v5418_v61 = vsel %vm776_vm1, %v5382_v16, %v6051_v53  ;;  %v2934_v62 = vsel %vm776_vm1, %v2898_v54, %v6050_v56 }
 0x8d5   :  { %v6059_v47 = vpop.permute.xlu1 %6058  ;;  %v2936_v58 = vsel %vm2935_vm3, %v2934_v62, %v6055_v57  ;;  %v5419_v43 = vsel %vm2935_vm3, %v5418_v61, %v6056_v13 }
 0x8d6   :  { %v6061_v63 = vunpack.i.h.bf16 %v6059_v47  ;;  %v6060_v1 = vunpack.i.l.bf16 %v6059_v47 }
 0x8d8   :  { %v2938_v7 = vsel %vm2937_vm4, %v2936_v58, %v6060_v1  ;;  %v5420_v8 = vsel %vm2937_vm4, %v5419_v43, %v6061_v63 }
 0x8e0   :  { %v6064_v60 = vpop.permute.xlu1 %6063  ;;  %v6074_v37 = vpop.permute.xlu0 %6073 }
 0x8e1   :  { %v6066_v2 = vunpack.i.h.bf16 %v6064_v60  ;;  %v6065_v50 = vunpack.i.l.bf16 %v6064_v60  ;;  %v6076_v54 = vunpack.i.h.bf16 %v6074_v37  ;;  %v6075_v17 = vunpack.i.l.bf16 %v6074_v37 }
 0x8e3   :  { %v2940_v9 = vsel %vm2939_vm5, %v2938_v7, %v6065_v50  ;;  %v5421_v12 = vsel %vm2939_vm5, %v5420_v8, %v6066_v2 }
 0x8e4   :  { %v6069_v6 = vpop.permute.xlu1 %6068 }
 0x8e5   :  { %v6071_v42 = vunpack.i.h.bf16 %v6069_v6  ;;  %v6070_v16 = vunpack.i.l.bf16 %v6069_v6 }
 0x8e7   :  { %v2942_v10 = vsel %vm2941_vm6, %v2940_v9, %v6070_v16  ;;  %v5422_v11 = vsel %vm2941_vm6, %v5421_v12, %v6071_v42 }
 0x8e8   :  { %v6079_v18 = vpop.permute.xlu1 %6078  ;;  %v2944_v59 = vsel %vm2943_vm7, %v2942_v10, %v6075_v17  ;;  %v5423_v24 = vsel %vm2943_vm7, %v5422_v11, %v6076_v54 }
 0x8e9   :  { %v6081_v20 = vunpack.i.h.bf16 %v6079_v18  ;;  %v6080_v39 = vunpack.i.l.bf16 %v6079_v18 }
 0x8eb   :  { %v2946_v19 = vsel %vm2945_vm8, %v2944_v59, %v6080_v39  ;;  %v5424_v3 = vsel %vm2945_vm8, %v5423_v24, %v6081_v20 }
 0x8ec   :  { %v5425_v4 = vpack.c.bf16 %v5424_v3, %v2946_v19 }
 0x8ee   :  { %6023 = vmatmul.mubr.bf16.vlgmr.msra.gmra.mxu0 %v5425_v4 }
 0x9ae   :  { %v5524_v5 = vpop.f32.mrf.mxu0 }
 0x9af   :  { %5531 = vst [vmem:[#allocation8] sm:$0xff] %v5524_v5 }
 0x9b0   :  { %v6024_v41 = vpop.f32.mrf.mxu0 }
 0x9b2   :  { %v5527_v25 = vpop.f32.mrf.mxu0 }
 0x9b3   :  { %5532 = vst [vmem:[#allocation8 + $0x8] sm:$0xff] %v5527_v25 }
 0x9b4   :  { %v6025_v14 = vpop.f32.mrf.mxu0 }
 0x9b5   :  { %6281 = shalt.err (!%p6278_p5)
}
 0x9b6   :  { %5544 = dma.vmem_to_hbm [thread:$0]  %s5539_s15, 256, %s6952_s4, [#allocation4], %s6300_s25, %s6300_s25, %s6301_s26  }
 0x9b7   :  { %6294 = dma.done.wait [#allocation4], 256  }
 0x9b8   :  { %6295 = vsyncadd [#allocation4], 4294967040 }
 0x9b9   :  { %5548 = vsyncpa [#allocation3], 1 }
 0x9ba   :  { %5549 = vsyncpa [#allocation6], 1 }
 0x9bb   :  { %5550 = vsyncpa [#allocation4], 1 }

</bundles_post_ra>
